<compile_context>
chip_gen: v6e
topology: v6e:2x2x1
jax: 0.10.0
libtpu: 0.0.40
codegen_flags: <defaults>
</compile_context>

<pallas_src>
import functools

import jax
import jax.numpy as jnp
import numpy as np
from jax.experimental import pallas as pl
from jax.experimental.pallas import tpu as pltpu


def _sigmoid(x):
    # One EUP tanh per gate instead of exp + full-precision divide/reciprocal.
    return 0.5 * jnp.tanh(0.5 * x) + 0.5


def _lstm_decoder_kernel(h_ref, c_ref, w_ref, b_ref, out_ref, hx_s, cx_s,
                         *, batch, hidden, hp, tc):
    """Runs `tc` decoder time steps per grid iteration (output-then-step).

    Refs (VMEM):
      h_ref  : (Bp, Hp)     f32   hx after step 0 (computed in the wrapper)
      c_ref  : (Bp, Hp)     f32   cx after step 0
      w_ref  : (Hp, 4*Hp)   bf16  folded recurrent weight W_rec (gate-block padded)
      b_ref  : (1, 4*Hp)    f32   folded recurrent bias b_rec (gate-block padded)
      out_ref: (B, Tc, H)   f32   output block for this (time-reversed) chunk
    Scratch (persists across grid steps):
      hx_s, cx_s : (Bp, Hp) f32   cross-chunk carried state
    """
    c = pl.program_id(0)

    @pl.when(c == 0)
    def _():
        hx_s[...] = h_ref[...]
        cx_s[...] = c_ref[...]

    bp = hx_s.shape[0]
    w = w_ref[...]                                            # (Hp, 4Hp) bf16
    bias_b = jnp.broadcast_to(b_ref[...], (bp, 4 * hp))       # hoisted broadcast

    # Carry state in registers across the statically unrolled chunk.
    hx = hx_s[...]                                            # (Bp, Hp) f32
    cx = cx_s[...]                                            # (Bp, Hp) f32

    for j in range(tc):
        # Carried hx is the decoder hidden state of global step c*tc + j.
        # decoder_output[::-1]: local step j lands at reversed in-block index.
        out_ref[:, pl.ds(tc - 1 - j, 1), :] = (
            hx[:batch, None, :hidden].astype(out_ref.dtype))

        # Folded recurrence: gates = hx @ (W_hi^T W_ih^T + W_hh^T) + b_rec.
        gates = jnp.dot(hx.astype(jnp.bfloat16), w,
                        preferred_element_type=jnp.float32) + bias_b
        i_g = _sigmoid(gates[:, 0 * hp:1 * hp])
        f_g = _sigmoid(gates[:, 1 * hp:2 * hp])
        g_g = jnp.tanh(gates[:, 2 * hp:3 * hp])
        o_g = _sigmoid(gates[:, 3 * hp:4 * hp])

        cx = f_g * cx + i_g * g_g
        hx = o_g * jnp.tanh(cx)

    # Single cross-chunk carry store per chunk (last chunk's final step is
    # a throwaway extra update; its result is never read).
    hx_s[...] = hx
    cx_s[...] = cx


def _pick_time_chunk(seq_len):
    """Widest divisor of S capped at 32 (never unrolls the whole sequence)."""
    for tc in range(min(seq_len, 32), 0, -1):
        if seq_len % tc == 0:
            return tc
    return 1


def _round_up(x, m):
    return ((x + m - 1) // m) * m


def _vmem_limit_bytes():
    # ~80% of the physical per-core VMEM, capped at 110 MiB:
    #   v7x (64 MiB/core)  -> ~51 MiB ;  v5e/v6e (128 MiB) -> ~102 MiB.
    try:
        cap = pltpu.get_tpu_info().vmem_capacity_bytes
    except Exception:
        cap = 128 * 1024 * 1024
    return int(min(110 * 1024 * 1024, int(cap * 0.8)))


def seq2seq_decoder_forward(x, encoder_output_h, params):
    """Pallas implementation of Sequence2SequenceDecoder.forward.

    x:                (B, S, H)  -- only its shape is used (as in PyTorch)
    encoder_output_h: (B, H)
    returns:          (B, S, H)  time-reversed decoder hidden states
    """
    B, S, H = x.shape
    I = params["b_hi"].shape[0]  # input_size

    Tc = _pick_time_chunk(S)
    nc = S // Tc
    Bp = max(8, _round_up(B, 8))        # f32 sublane width
    Hp = max(128, _round_up(H, 128))    # lane width, per gate block

    f32 = jnp.float32
    w_ih = params["w_ih"].astype(f32)                     # (4H, I)
    w_hh = params["w_hh"].astype(f32)                     # (4H, H)
    b_lstm = (params["b_ih"] + params["b_hh"]).astype(f32)  # (4H,)
    w_hi = params["w_hi"].astype(f32)                     # (I, H)
    b_hi = params["b_hi"].astype(f32)                     # (I,)

    # ---- fold hidden_to_input into the recurrence (f32 composition) ----------
    # For t >= 1: input = hx @ W_hi^T + b_hi, hence
    #   gates = hx @ (W_hi^T @ W_ih^T + W_hh^T) + (b_hi @ W_ih^T + b_ih + b_hh)
    w_rec = w_hi.T @ w_ih.T + w_hh.T                      # (H, 4H) f32
    b_rec = b_hi @ w_ih.T + b_lstm                        # (4H,)   f32

    # ---- step 0 (input == 0) as a tiny f32 XLA matmul in the wrapper ---------
    h0 = encoder_output_h.astype(f32)
    gates0 = h0 @ w_hh.T + b_lstm
    i0 = jax.nn.sigmoid(gates0[:, :H])
    f0 = jax.nn.sigmoid(gates0[:, H:2 * H])
    g0 = jnp.tanh(gates0[:, 2 * H:3 * H])
    o0 = jax.nn.sigmoid(gates0[:, 3 * H:])
    c1 = i0 * g0                      # cx starts at zero, so f0 * 0 vanishes
    h1 = o0 * jnp.tanh(c1)

    # ---- pad to lane/sublane-friendly shapes ----------------------------------
    # Gate g occupies columns [g*Hp, g*Hp + H); padded rows/cols are zero, so the
    # padded lanes of hx/cx remain exactly zero through the whole recurrence.
    w_rec_p = jnp.zeros((Hp, 4 * Hp), f32)
    b_rec_p = jnp.zeros((4 * Hp,), f32)
    for g in range(4):
        w_rec_p = w_rec_p.at[:H, g * Hp:g * Hp + H].set(w_rec[:, g * H:(g + 1) * H])
        b_rec_p = b_rec_p.at[g * Hp:g * Hp + H].set(b_rec[g * H:(g + 1) * H])
    w_rec_p = w_rec_p.astype(jnp.bfloat16)                # (Hp, 4Hp) bf16
    b_rec_p = b_rec_p[None, :]                            # (1, 4Hp)  f32

    h1p = jnp.zeros((Bp, Hp), f32).at[:B, :H].set(h1)
    c1p = jnp.zeros((Bp, Hp), f32).at[:B, :H].set(c1)

    kernel = functools.partial(_lstm_decoder_kernel,
                               batch=B, hidden=H, hp=Hp, tc=Tc)

    def const_spec(shape):
        # Grid-invariant input: constant index_map + single buffer (double
        # buffering something DMA'd once is pure VMEM waste).
        return pl.BlockSpec(shape, lambda c: (0,) * len(shape),
                            pipeline_mode=pl.Buffered(1))

    out = pl.pallas_call(
        kernel,
        out_shape=jax.ShapeDtypeStruct((B, S, H), jnp.float32),
        grid_spec=pltpu.PrefetchScalarGridSpec(
            num_scalar_prefetch=0,
            grid=(nc,),
            in_specs=[
                const_spec((Bp, Hp)),           # h1 (state after step 0)
                const_spec((Bp, Hp)),           # c1
                const_spec((Hp, 4 * Hp)),       # folded recurrent weight (bf16)
                const_spec((1, 4 * Hp)),        # folded recurrent bias
            ],
            # Time reversal folded into the output index_map: chunk c fills the
            # reversed time block nc-1-c.
            out_specs=pl.BlockSpec((B, Tc, H), lambda c: (0, nc - 1 - c, 0)),
            scratch_shapes=[
                pltpu.VMEM((Bp, Hp), jnp.float32),   # carried hx
                pltpu.VMEM((Bp, Hp), jnp.float32),   # carried cx
            ],
        ),
        compiler_params=pltpu.CompilerParams(
            # The recurrence is sequential in time -> "arbitrary". For v7x
            # serving batches, add a leading "parallel" batch-block axis.
            dimension_semantics=("arbitrary",),
            vmem_limit_bytes=_vmem_limit_bytes(),
        ),
    )(h1p, c1p, w_rec_p, b_rec_p)

    return out


def _reference_forward(x, h0, params):
    """Pure-JAX f32 reference (mirrors the PyTorch forward exactly)."""
    B, S, H = x.shape
    I = params["b_hi"].shape[0]

    def step(carry, _):
        hx, cx, inp = carry
        gates = (inp @ params["w_ih"].T + params["b_ih"]
                 + hx @ params["w_hh"].T + params["b_hh"])
        i_g = jax.nn.sigmoid(gates[:, :H])
        f_g = jax.nn.sigmoid(gates[:, H:2 * H])
        g_g = jnp.tanh(gates[:, 2 * H:3 * H])
        o_g = jax.nn.sigmoid(gates[:, 3 * H:])
        c_new = f_g * cx + i_g * g_g
        h_new = o_g * jnp.tanh(c_new)
        inp_new = h_new @ params["w_hi"].T + params["b_hi"]
        return (h_new, c_new, inp_new), h_new

    init = (h0, jnp.zeros_like(h0), jnp.zeros((B, I), jnp.float32))
    _, hs = jax.lax.scan(step, init, None, length=S)
    hs = hs[::-1]                          # decoder_output[::-1]
    return jnp.transpose(hs, (1, 0, 2))    # stack along dim 1


def make_params(key, input_size, hidden_size):
    """Deterministic synthetic parameters (PyTorch-like uniform init)."""
    ks = jax.random.split(key, 6)
    k = 1.0 / np.sqrt(hidden_size)
    u = lambda kk, shape: jax.random.uniform(kk, shape, jnp.float32, -k, k)
    return {
        "w_ih": u(ks[0], (4 * hidden_size, input_size)),   # LSTMCell weight_ih
        "w_hh": u(ks[1], (4 * hidden_size, hidden_size)),  # LSTMCell weight_hh
        "b_ih": u(ks[2], (4 * hidden_size,)),
        "b_hh": u(ks[3], (4 * hidden_size,)),
        "w_hi": u(ks[4], (input_size, hidden_size)),       # hidden_to_input (Linear)
        "b_hi": u(ks[5], (input_size,)),
    }


if __name__ == "__main__":
    B, S, H, I = 2, 8, 32, 16   # batch, seq, hidden_size, input_size

    key = jax.random.PRNGKey(0)
    k_x, k_h, k_p = jax.random.split(key, 3)

    x = jax.random.normal(k_x, (B, S, H), jnp.float32)   # only its shape is used
    encoder_output_h = jax.random.normal(k_h, (B, H), jnp.float32)
    params = make_params(k_p, I, H)

    out = seq2seq_decoder_forward(x, encoder_output_h, params)
    out = jax.block_until_ready(out)

    ref = jax.block_until_ready(_reference_forward(x, encoder_output_h, params))
    assert out.shape == (B, S, H)
    # Kernel uses a bf16 folded recurrent weight on the MXU (f32 accumulation and
    # f32 carried state), so compare at bf16-appropriate tolerance.
    np.testing.assert_allclose(np.asarray(out), np.asarray(ref),
                               rtol=5e-2, atol=5e-2)

    print("KERNEL_OK")
</pallas_src>

<mosaic_0001>
module attributes {stable_mosaic.version = 11 : i64} {
  func.func @_lstm_decoder_kernel(%arg0: i32, %arg1: memref<8x128xf32, #tpu.memory_space<vmem>>, %arg2: memref<8x128xf32, #tpu.memory_space<vmem>>, %arg3: memref<128x512xbf16, #tpu.memory_space<vmem>>, %arg4: memref<1x512xf32, #tpu.memory_space<vmem>>, %arg5: memref<2x8x32xf32, #tpu.memory_space<vmem>>, %arg6: memref<8x128xf32, #tpu.memory_space<vmem>>, %arg7: memref<8x128xf32, #tpu.memory_space<vmem>>) attributes {dimension_semantics = [#tpu.dimension_semantics<arbitrary>], iteration_bounds = array<i64: 1>, scalar_prefetch = 0 : i64, scratch_operands = 2 : i64, tpu.core_type = #tpu.core_type<tc>, window_params = [{pipeline_mode = #tpu.pipeline_mode<synchronous>, transform_indices = @transform_0, window_bounds = array<i64: 8, 128>}, {pipeline_mode = #tpu.pipeline_mode<synchronous>, transform_indices = @transform_1, window_bounds = array<i64: 8, 128>}, {pipeline_mode = #tpu.pipeline_mode<synchronous>, transform_indices = @transform_2, window_bounds = array<i64: 128, 512>}, {pipeline_mode = #tpu.pipeline_mode<synchronous>, transform_indices = @transform_3, window_bounds = array<i64: 1, 512>}, {transform_indices = @transform_4, window_bounds = array<i64: 2, 8, 32>}]} {
    %c0_i32 = arith.constant 0 : i32
    %0 = arith.cmpi eq, %arg0, %c0_i32 : i32
    %1 = arith.extui %0 : i1 to i32
    %c0_i32_0 = arith.constant 0 : i32
    %2 = arith.cmpi ne, %1, %c0_i32_0 : i32
    scf.if %2 {
      %c0_108 = arith.constant 0 : index
      %c0_109 = arith.constant 0 : index
      %307 = vector.load %arg1[%c0_108, %c0_109] : memref<8x128xf32, #tpu.memory_space<vmem>>, vector<8x128xf32>
      %c0_110 = arith.constant 0 : index
      %c0_111 = arith.constant 0 : index
      %308 = vector.load %arg6[%c0_110, %c0_111] : memref<8x128xf32, #tpu.memory_space<vmem>>, vector<8x128xf32>
      tpu.vector_store %arg6[%c0_110, %c0_111], %307 {strides = array<i32>} : memref<8x128xf32, #tpu.memory_space<vmem>>, vector<8x128xf32>,
      %c0_112 = arith.constant 0 : index
      %c0_113 = arith.constant 0 : index
      %309 = vector.load %arg2[%c0_112, %c0_113] : memref<8x128xf32, #tpu.memory_space<vmem>>, vector<8x128xf32>
      %c0_114 = arith.constant 0 : index
      %c0_115 = arith.constant 0 : index
      %310 = vector.load %arg7[%c0_114, %c0_115] : memref<8x128xf32, #tpu.memory_space<vmem>>, vector<8x128xf32>
      tpu.vector_store %arg7[%c0_114, %c0_115], %309 {strides = array<i32>} : memref<8x128xf32, #tpu.memory_space<vmem>>, vector<8x128xf32>,
    } else {
    }
    %c0 = arith.constant 0 : index
    %c0_1 = arith.constant 0 : index
    %3 = vector.load %arg3[%c0, %c0_1] : memref<128x512xbf16, #tpu.memory_space<vmem>>, vector<128x512xbf16>
    %c0_2 = arith.constant 0 : index
    %c0_3 = arith.constant 0 : index
    %4 = vector.load %arg4[%c0_2, %c0_3] : memref<1x512xf32, #tpu.memory_space<vmem>>, vector<1x512xf32>
    %5 = vector.shape_cast %4 : vector<1x512xf32> to vector<1x512xf32>
    %6 = vector.broadcast %5 : vector<1x512xf32> to vector<8x512xf32>
    %c0_4 = arith.constant 0 : index
    %c0_5 = arith.constant 0 : index
    %7 = vector.load %arg6[%c0_4, %c0_5] : memref<8x128xf32, #tpu.memory_space<vmem>>, vector<8x128xf32>
    %c0_6 = arith.constant 0 : index
    %c0_7 = arith.constant 0 : index
    %8 = vector.load %arg7[%c0_6, %c0_7] : memref<8x128xf32, #tpu.memory_space<vmem>>, vector<8x128xf32>
    %9 = vector.extract_strided_slice %7 {offsets = [0, 0], sizes = [2, 32], strides = [1, 1]} : vector<8x128xf32> to vector<2x32xf32>
    %10 = vector.shape_cast %9 : vector<2x32xf32> to vector<2x1x32xf32>
    %c0_8 = arith.constant 0 : index
    %c7 = arith.constant 7 : index
    %c0_9 = arith.constant 0 : index
    %11 = vector.load %arg5[%c0_8, %c7, %c0_9] : memref<2x8x32xf32, #tpu.memory_space<vmem>>, vector<2x1x32xf32>
    tpu.vector_store %arg5[%c0_8, %c7, %c0_9], %10 {strides = array<i32>} : memref<2x8x32xf32, #tpu.memory_space<vmem>>, vector<2x1x32xf32>,
    %12 = arith.truncf %7 : vector<8x128xf32> to vector<8x128xbf16>
    %cst = arith.constant dense<0.000000e+00> : vector<8x512xf32>
    %13 = tpu.matmul %12, %3, %cst {dimension_numbers = #tpu.dot_dimension_numbers<[1], [0], [0], [1], [0, 0, 1, 1], [], []>} : vector<8x128xbf16>, vector<128x512xbf16>, vector<8x512xf32> -> vector<8x512xf32>
    %14 = arith.addf %13, %6 : vector<8x512xf32>
    %15 = vector.extract_strided_slice %14 {offsets = [0, 0], sizes = [8, 128], strides = [1, 1]} : vector<8x512xf32> to vector<8x128xf32>
    %cst_10 = arith.constant 5.000000e-01 : f32
    %16 = vector.broadcast %cst_10 : f32 to vector<8x128xf32>
    %17 = arith.mulf %16, %15 : vector<8x128xf32>
    %18 = math.tanh %17 : vector<8x128xf32>
    %cst_11 = arith.constant 5.000000e-01 : f32
    %19 = vector.broadcast %cst_11 : f32 to vector<8x128xf32>
    %20 = arith.mulf %19, %18 : vector<8x128xf32>
    %cst_12 = arith.constant 5.000000e-01 : f32
    %21 = vector.broadcast %cst_12 : f32 to vector<8x128xf32>
    %22 = arith.addf %20, %21 : vector<8x128xf32>
    %23 = vector.extract_strided_slice %14 {offsets = [0, 128], sizes = [8, 128], strides = [1, 1]} : vector<8x512xf32> to vector<8x128xf32>
    %cst_13 = arith.constant 5.000000e-01 : f32
    %24 = vector.broadcast %cst_13 : f32 to vector<8x128xf32>
    %25 = arith.mulf %24, %23 : vector<8x128xf32>
    %26 = math.tanh %25 : vector<8x128xf32>
    %cst_14 = arith.constant 5.000000e-01 : f32
    %27 = vector.broadcast %cst_14 : f32 to vector<8x128xf32>
    %28 = arith.mulf %27, %26 : vector<8x128xf32>
    %cst_15 = arith.constant 5.000000e-01 : f32
    %29 = vector.broadcast %cst_15 : f32 to vector<8x128xf32>
    %30 = arith.addf %28, %29 : vector<8x128xf32>
    %31 = vector.extract_strided_slice %14 {offsets = [0, 256], sizes = [8, 128], strides = [1, 1]} : vector<8x512xf32> to vector<8x128xf32>
    %32 = math.tanh %31 : vector<8x128xf32>
    %33 = vector.extract_strided_slice %14 {offsets = [0, 384], sizes = [8, 128], strides = [1, 1]} : vector<8x512xf32> to vector<8x128xf32>
    %cst_16 = arith.constant 5.000000e-01 : f32
    %34 = vector.broadcast %cst_16 : f32 to vector<8x128xf32>
    %35 = arith.mulf %34, %33 : vector<8x128xf32>
    %36 = math.tanh %35 : vector<8x128xf32>
    %cst_17 = arith.constant 5.000000e-01 : f32
    %37 = vector.broadcast %cst_17 : f32 to vector<8x128xf32>
    %38 = arith.mulf %37, %36 : vector<8x128xf32>
    %cst_18 = arith.constant 5.000000e-01 : f32
    %39 = vector.broadcast %cst_18 : f32 to vector<8x128xf32>
    %40 = arith.addf %38, %39 : vector<8x128xf32>
    %41 = arith.mulf %30, %8 : vector<8x128xf32>
    %42 = arith.mulf %22, %32 : vector<8x128xf32>
    %43 = arith.addf %41, %42 : vector<8x128xf32>
    %44 = math.tanh %43 : vector<8x128xf32>
    %45 = arith.mulf %40, %44 : vector<8x128xf32>
    %46 = vector.extract_strided_slice %45 {offsets = [0, 0], sizes = [2, 32], strides = [1, 1]} : vector<8x128xf32> to vector<2x32xf32>
    %47 = vector.shape_cast %46 : vector<2x32xf32> to vector<2x1x32xf32>
    %c0_19 = arith.constant 0 : index
    %c6 = arith.constant 6 : index
    %c0_20 = arith.constant 0 : index
    %48 = vector.load %arg5[%c0_19, %c6, %c0_20] : memref<2x8x32xf32, #tpu.memory_space<vmem>>, vector<2x1x32xf32>
    tpu.vector_store %arg5[%c0_19, %c6, %c0_20], %47 {strides = array<i32>} : memref<2x8x32xf32, #tpu.memory_space<vmem>>, vector<2x1x32xf32>,
    %49 = arith.truncf %45 : vector<8x128xf32> to vector<8x128xbf16>
    %cst_21 = arith.constant dense<0.000000e+00> : vector<8x512xf32>
    %50 = tpu.matmul %49, %3, %cst_21 {dimension_numbers = #tpu.dot_dimension_numbers<[1], [0], [0], [1], [0, 0, 1, 1], [], []>} : vector<8x128xbf16>, vector<128x512xbf16>, vector<8x512xf32> -> vector<8x512xf32>
    %51 = arith.addf %50, %6 : vector<8x512xf32>
    %52 = vector.extract_strided_slice %51 {offsets = [0, 0], sizes = [8, 128], strides = [1, 1]} : vector<8x512xf32> to vector<8x128xf32>
    %cst_22 = arith.constant 5.000000e-01 : f32
    %53 = vector.broadcast %cst_22 : f32 to vector<8x128xf32>
    %54 = arith.mulf %53, %52 : vector<8x128xf32>
    %55 = math.tanh %54 : vector<8x128xf32>
    %cst_23 = arith.constant 5.000000e-01 : f32
    %56 = vector.broadcast %cst_23 : f32 to vector<8x128xf32>
    %57 = arith.mulf %56, %55 : vector<8x128xf32>
    %cst_24 = arith.constant 5.000000e-01 : f32
    %58 = vector.broadcast %cst_24 : f32 to vector<8x128xf32>
    %59 = arith.addf %57, %58 : vector<8x128xf32>
    %60 = vector.extract_strided_slice %51 {offsets = [0, 128], sizes = [8, 128], strides = [1, 1]} : vector<8x512xf32> to vector<8x128xf32>
    %cst_25 = arith.constant 5.000000e-01 : f32
    %61 = vector.broadcast %cst_25 : f32 to vector<8x128xf32>
    %62 = arith.mulf %61, %60 : vector<8x128xf32>
    %63 = math.tanh %62 : vector<8x128xf32>
    %cst_26 = arith.constant 5.000000e-01 : f32
    %64 = vector.broadcast %cst_26 : f32 to vector<8x128xf32>
    %65 = arith.mulf %64, %63 : vector<8x128xf32>
    %cst_27 = arith.constant 5.000000e-01 : f32
    %66 = vector.broadcast %cst_27 : f32 to vector<8x128xf32>
    %67 = arith.addf %65, %66 : vector<8x128xf32>
    %68 = vector.extract_strided_slice %51 {offsets = [0, 256], sizes = [8, 128], strides = [1, 1]} : vector<8x512xf32> to vector<8x128xf32>
    %69 = math.tanh %68 : vector<8x128xf32>
    %70 = vector.extract_strided_slice %51 {offsets = [0, 384], sizes = [8, 128], strides = [1, 1]} : vector<8x512xf32> to vector<8x128xf32>
    %cst_28 = arith.constant 5.000000e-01 : f32
    %71 = vector.broadcast %cst_28 : f32 to vector<8x128xf32>
    %72 = arith.mulf %71, %70 : vector<8x128xf32>
    %73 = math.tanh %72 : vector<8x128xf32>
    %cst_29 = arith.constant 5.000000e-01 : f32
    %74 = vector.broadcast %cst_29 : f32 to vector<8x128xf32>
    %75 = arith.mulf %74, %73 : vector<8x128xf32>
    %cst_30 = arith.constant 5.000000e-01 : f32
    %76 = vector.broadcast %cst_30 : f32 to vector<8x128xf32>
    %77 = arith.addf %75, %76 : vector<8x128xf32>
    %78 = arith.mulf %67, %43 : vector<8x128xf32>
    %79 = arith.mulf %59, %69 : vector<8x128xf32>
    %80 = arith.addf %78, %79 : vector<8x128xf32>
    %81 = math.tanh %80 : vector<8x128xf32>
    %82 = arith.mulf %77, %81 : vector<8x128xf32>
    %83 = vector.extract_strided_slice %82 {offsets = [0, 0], sizes = [2, 32], strides = [1, 1]} : vector<8x128xf32> to vector<2x32xf32>
    %84 = vector.shape_cast %83 : vector<2x32xf32> to vector<2x1x32xf32>
    %c0_31 = arith.constant 0 : index
    %c5 = arith.constant 5 : index
    %c0_32 = arith.constant 0 : index
    %85 = vector.load %arg5[%c0_31, %c5, %c0_32] : memref<2x8x32xf32, #tpu.memory_space<vmem>>, vector<2x1x32xf32>
    tpu.vector_store %arg5[%c0_31, %c5, %c0_32], %84 {strides = array<i32>} : memref<2x8x32xf32, #tpu.memory_space<vmem>>, vector<2x1x32xf32>,
    %86 = arith.truncf %82 : vector<8x128xf32> to vector<8x128xbf16>
    %cst_33 = arith.constant dense<0.000000e+00> : vector<8x512xf32>
    %87 = tpu.matmul %86, %3, %cst_33 {dimension_numbers = #tpu.dot_dimension_numbers<[1], [0], [0], [1], [0, 0, 1, 1], [], []>} : vector<8x128xbf16>, vector<128x512xbf16>, vector<8x512xf32> -> vector<8x512xf32>
    %88 = arith.addf %87, %6 : vector<8x512xf32>
    %89 = vector.extract_strided_slice %88 {offsets = [0, 0], sizes = [8, 128], strides = [1, 1]} : vector<8x512xf32> to vector<8x128xf32>
    %cst_34 = arith.constant 5.000000e-01 : f32
    %90 = vector.broadcast %cst_34 : f32 to vector<8x128xf32>
    %91 = arith.mulf %90, %89 : vector<8x128xf32>
    %92 = math.tanh %91 : vector<8x128xf32>
    %cst_35 = arith.constant 5.000000e-01 : f32
    %93 = vector.broadcast %cst_35 : f32 to vector<8x128xf32>
    %94 = arith.mulf %93, %92 : vector<8x128xf32>
    %cst_36 = arith.constant 5.000000e-01 : f32
    %95 = vector.broadcast %cst_36 : f32 to vector<8x128xf32>
    %96 = arith.addf %94, %95 : vector<8x128xf32>
    %97 = vector.extract_strided_slice %88 {offsets = [0, 128], sizes = [8, 128], strides = [1, 1]} : vector<8x512xf32> to vector<8x128xf32>
    %cst_37 = arith.constant 5.000000e-01 : f32
    %98 = vector.broadcast %cst_37 : f32 to vector<8x128xf32>
    %99 = arith.mulf %98, %97 : vector<8x128xf32>
    %100 = math.tanh %99 : vector<8x128xf32>
    %cst_38 = arith.constant 5.000000e-01 : f32
    %101 = vector.broadcast %cst_38 : f32 to vector<8x128xf32>
    %102 = arith.mulf %101, %100 : vector<8x128xf32>
    %cst_39 = arith.constant 5.000000e-01 : f32
    %103 = vector.broadcast %cst_39 : f32 to vector<8x128xf32>
    %104 = arith.addf %102, %103 : vector<8x128xf32>
    %105 = vector.extract_strided_slice %88 {offsets = [0, 256], sizes = [8, 128], strides = [1, 1]} : vector<8x512xf32> to vector<8x128xf32>
    %106 = math.tanh %105 : vector<8x128xf32>
    %107 = vector.extract_strided_slice %88 {offsets = [0, 384], sizes = [8, 128], strides = [1, 1]} : vector<8x512xf32> to vector<8x128xf32>
    %cst_40 = arith.constant 5.000000e-01 : f32
    %108 = vector.broadcast %cst_40 : f32 to vector<8x128xf32>
    %109 = arith.mulf %108, %107 : vector<8x128xf32>
    %110 = math.tanh %109 : vector<8x128xf32>
    %cst_41 = arith.constant 5.000000e-01 : f32
    %111 = vector.broadcast %cst_41 : f32 to vector<8x128xf32>
    %112 = arith.mulf %111, %110 : vector<8x128xf32>
    %cst_42 = arith.constant 5.000000e-01 : f32
    %113 = vector.broadcast %cst_42 : f32 to vector<8x128xf32>
    %114 = arith.addf %112, %113 : vector<8x128xf32>
    %115 = arith.mulf %104, %80 : vector<8x128xf32>
    %116 = arith.mulf %96, %106 : vector<8x128xf32>
    %117 = arith.addf %115, %116 : vector<8x128xf32>
    %118 = math.tanh %117 : vector<8x128xf32>
    %119 = arith.mulf %114, %118 : vector<8x128xf32>
    %120 = vector.extract_strided_slice %119 {offsets = [0, 0], sizes = [2, 32], strides = [1, 1]} : vector<8x128xf32> to vector<2x32xf32>
    %121 = vector.shape_cast %120 : vector<2x32xf32> to vector<2x1x32xf32>
    %c0_43 = arith.constant 0 : index
    %c4 = arith.constant 4 : index
    %c0_44 = arith.constant 0 : index
    %122 = vector.load %arg5[%c0_43, %c4, %c0_44] : memref<2x8x32xf32, #tpu.memory_space<vmem>>, vector<2x1x32xf32>
    tpu.vector_store %arg5[%c0_43, %c4, %c0_44], %121 {strides = array<i32>} : memref<2x8x32xf32, #tpu.memory_space<vmem>>, vector<2x1x32xf32>,
    %123 = arith.truncf %119 : vector<8x128xf32> to vector<8x128xbf16>
    %cst_45 = arith.constant dense<0.000000e+00> : vector<8x512xf32>
    %124 = tpu.matmul %123, %3, %cst_45 {dimension_numbers = #tpu.dot_dimension_numbers<[1], [0], [0], [1], [0, 0, 1, 1], [], []>} : vector<8x128xbf16>, vector<128x512xbf16>, vector<8x512xf32> -> vector<8x512xf32>
    %125 = arith.addf %124, %6 : vector<8x512xf32>
    %126 = vector.extract_strided_slice %125 {offsets = [0, 0], sizes = [8, 128], strides = [1, 1]} : vector<8x512xf32> to vector<8x128xf32>
    %cst_46 = arith.constant 5.000000e-01 : f32
    %127 = vector.broadcast %cst_46 : f32 to vector<8x128xf32>
    %128 = arith.mulf %127, %126 : vector<8x128xf32>
    %129 = math.tanh %128 : vector<8x128xf32>
    %cst_47 = arith.constant 5.000000e-01 : f32
    %130 = vector.broadcast %cst_47 : f32 to vector<8x128xf32>
    %131 = arith.mulf %130, %129 : vector<8x128xf32>
    %cst_48 = arith.constant 5.000000e-01 : f32
    %132 = vector.broadcast %cst_48 : f32 to vector<8x128xf32>
    %133 = arith.addf %131, %132 : vector<8x128xf32>
    %134 = vector.extract_strided_slice %125 {offsets = [0, 128], sizes = [8, 128], strides = [1, 1]} : vector<8x512xf32> to vector<8x128xf32>
    %cst_49 = arith.constant 5.000000e-01 : f32
    %135 = vector.broadcast %cst_49 : f32 to vector<8x128xf32>
    %136 = arith.mulf %135, %134 : vector<8x128xf32>
    %137 = math.tanh %136 : vector<8x128xf32>
    %cst_50 = arith.constant 5.000000e-01 : f32
    %138 = vector.broadcast %cst_50 : f32 to vector<8x128xf32>
    %139 = arith.mulf %138, %137 : vector<8x128xf32>
    %cst_51 = arith.constant 5.000000e-01 : f32
    %140 = vector.broadcast %cst_51 : f32 to vector<8x128xf32>
    %141 = arith.addf %139, %140 : vector<8x128xf32>
    %142 = vector.extract_strided_slice %125 {offsets = [0, 256], sizes = [8, 128], strides = [1, 1]} : vector<8x512xf32> to vector<8x128xf32>
    %143 = math.tanh %142 : vector<8x128xf32>
    %144 = vector.extract_strided_slice %125 {offsets = [0, 384], sizes = [8, 128], strides = [1, 1]} : vector<8x512xf32> to vector<8x128xf32>
    %cst_52 = arith.constant 5.000000e-01 : f32
    %145 = vector.broadcast %cst_52 : f32 to vector<8x128xf32>
    %146 = arith.mulf %145, %144 : vector<8x128xf32>
    %147 = math.tanh %146 : vector<8x128xf32>
    %cst_53 = arith.constant 5.000000e-01 : f32
    %148 = vector.broadcast %cst_53 : f32 to vector<8x128xf32>
    %149 = arith.mulf %148, %147 : vector<8x128xf32>
    %cst_54 = arith.constant 5.000000e-01 : f32
    %150 = vector.broadcast %cst_54 : f32 to vector<8x128xf32>
    %151 = arith.addf %149, %150 : vector<8x128xf32>
    %152 = arith.mulf %141, %117 : vector<8x128xf32>
    %153 = arith.mulf %133, %143 : vector<8x128xf32>
    %154 = arith.addf %152, %153 : vector<8x128xf32>
    %155 = math.tanh %154 : vector<8x128xf32>
    %156 = arith.mulf %151, %155 : vector<8x128xf32>
    %157 = vector.extract_strided_slice %156 {offsets = [0, 0], sizes = [2, 32], strides = [1, 1]} : vector<8x128xf32> to vector<2x32xf32>
    %158 = vector.shape_cast %157 : vector<2x32xf32> to vector<2x1x32xf32>
    %c0_55 = arith.constant 0 : index
    %c3 = arith.constant 3 : index
    %c0_56 = arith.constant 0 : index
    %159 = vector.load %arg5[%c0_55, %c3, %c0_56] : memref<2x8x32xf32, #tpu.memory_space<vmem>>, vector<2x1x32xf32>
    tpu.vector_store %arg5[%c0_55, %c3, %c0_56], %158 {strides = array<i32>} : memref<2x8x32xf32, #tpu.memory_space<vmem>>, vector<2x1x32xf32>,
    %160 = arith.truncf %156 : vector<8x128xf32> to vector<8x128xbf16>
    %cst_57 = arith.constant dense<0.000000e+00> : vector<8x512xf32>
    %161 = tpu.matmul %160, %3, %cst_57 {dimension_numbers = #tpu.dot_dimension_numbers<[1], [0], [0], [1], [0, 0, 1, 1], [], []>} : vector<8x128xbf16>, vector<128x512xbf16>, vector<8x512xf32> -> vector<8x512xf32>
    %162 = arith.addf %161, %6 : vector<8x512xf32>
    %163 = vector.extract_strided_slice %162 {offsets = [0, 0], sizes = [8, 128], strides = [1, 1]} : vector<8x512xf32> to vector<8x128xf32>
    %cst_58 = arith.constant 5.000000e-01 : f32
    %164 = vector.broadcast %cst_58 : f32 to vector<8x128xf32>
    %165 = arith.mulf %164, %163 : vector<8x128xf32>
    %166 = math.tanh %165 : vector<8x128xf32>
    %cst_59 = arith.constant 5.000000e-01 : f32
    %167 = vector.broadcast %cst_59 : f32 to vector<8x128xf32>
    %168 = arith.mulf %167, %166 : vector<8x128xf32>
    %cst_60 = arith.constant 5.000000e-01 : f32
    %169 = vector.broadcast %cst_60 : f32 to vector<8x128xf32>
    %170 = arith.addf %168, %169 : vector<8x128xf32>
    %171 = vector.extract_strided_slice %162 {offsets = [0, 128], sizes = [8, 128], strides = [1, 1]} : vector<8x512xf32> to vector<8x128xf32>
    %cst_61 = arith.constant 5.000000e-01 : f32
    %172 = vector.broadcast %cst_61 : f32 to vector<8x128xf32>
    %173 = arith.mulf %172, %171 : vector<8x128xf32>
    %174 = math.tanh %173 : vector<8x128xf32>
    %cst_62 = arith.constant 5.000000e-01 : f32
    %175 = vector.broadcast %cst_62 : f32 to vector<8x128xf32>
    %176 = arith.mulf %175, %174 : vector<8x128xf32>
    %cst_63 = arith.constant 5.000000e-01 : f32
    %177 = vector.broadcast %cst_63 : f32 to vector<8x128xf32>
    %178 = arith.addf %176, %177 : vector<8x128xf32>
    %179 = vector.extract_strided_slice %162 {offsets = [0, 256], sizes = [8, 128], strides = [1, 1]} : vector<8x512xf32> to vector<8x128xf32>
    %180 = math.tanh %179 : vector<8x128xf32>
    %181 = vector.extract_strided_slice %162 {offsets = [0, 384], sizes = [8, 128], strides = [1, 1]} : vector<8x512xf32> to vector<8x128xf32>
    %cst_64 = arith.constant 5.000000e-01 : f32
    %182 = vector.broadcast %cst_64 : f32 to vector<8x128xf32>
    %183 = arith.mulf %182, %181 : vector<8x128xf32>
    %184 = math.tanh %183 : vector<8x128xf32>
    %cst_65 = arith.constant 5.000000e-01 : f32
    %185 = vector.broadcast %cst_65 : f32 to vector<8x128xf32>
    %186 = arith.mulf %185, %184 : vector<8x128xf32>
    %cst_66 = arith.constant 5.000000e-01 : f32
    %187 = vector.broadcast %cst_66 : f32 to vector<8x128xf32>
    %188 = arith.addf %186, %187 : vector<8x128xf32>
    %189 = arith.mulf %178, %154 : vector<8x128xf32>
    %190 = arith.mulf %170, %180 : vector<8x128xf32>
    %191 = arith.addf %189, %190 : vector<8x128xf32>
    %192 = math.tanh %191 : vector<8x128xf32>
    %193 = arith.mulf %188, %192 : vector<8x128xf32>
    %194 = vector.extract_strided_slice %193 {offsets = [0, 0], sizes = [2, 32], strides = [1, 1]} : vector<8x128xf32> to vector<2x32xf32>
    %195 = vector.shape_cast %194 : vector<2x32xf32> to vector<2x1x32xf32>
    %c0_67 = arith.constant 0 : index
    %c2 = arith.constant 2 : index
    %c0_68 = arith.constant 0 : index
    %196 = vector.load %arg5[%c0_67, %c2, %c0_68] : memref<2x8x32xf32, #tpu.memory_space<vmem>>, vector<2x1x32xf32>
    tpu.vector_store %arg5[%c0_67, %c2, %c0_68], %195 {strides = array<i32>} : memref<2x8x32xf32, #tpu.memory_space<vmem>>, vector<2x1x32xf32>,
    %197 = arith.truncf %193 : vector<8x128xf32> to vector<8x128xbf16>
    %cst_69 = arith.constant dense<0.000000e+00> : vector<8x512xf32>
    %198 = tpu.matmul %197, %3, %cst_69 {dimension_numbers = #tpu.dot_dimension_numbers<[1], [0], [0], [1], [0, 0, 1, 1], [], []>} : vector<8x128xbf16>, vector<128x512xbf16>, vector<8x512xf32> -> vector<8x512xf32>
    %199 = arith.addf %198, %6 : vector<8x512xf32>
    %200 = vector.extract_strided_slice %199 {offsets = [0, 0], sizes = [8, 128], strides = [1, 1]} : vector<8x512xf32> to vector<8x128xf32>
    %cst_70 = arith.constant 5.000000e-01 : f32
    %201 = vector.broadcast %cst_70 : f32 to vector<8x128xf32>
    %202 = arith.mulf %201, %200 : vector<8x128xf32>
    %203 = math.tanh %202 : vector<8x128xf32>
    %cst_71 = arith.constant 5.000000e-01 : f32
    %204 = vector.broadcast %cst_71 : f32 to vector<8x128xf32>
    %205 = arith.mulf %204, %203 : vector<8x128xf32>
    %cst_72 = arith.constant 5.000000e-01 : f32
    %206 = vector.broadcast %cst_72 : f32 to vector<8x128xf32>
    %207 = arith.addf %205, %206 : vector<8x128xf32>
    %208 = vector.extract_strided_slice %199 {offsets = [0, 128], sizes = [8, 128], strides = [1, 1]} : vector<8x512xf32> to vector<8x128xf32>
    %cst_73 = arith.constant 5.000000e-01 : f32
    %209 = vector.broadcast %cst_73 : f32 to vector<8x128xf32>
    %210 = arith.mulf %209, %208 : vector<8x128xf32>
    %211 = math.tanh %210 : vector<8x128xf32>
    %cst_74 = arith.constant 5.000000e-01 : f32
    %212 = vector.broadcast %cst_74 : f32 to vector<8x128xf32>
    %213 = arith.mulf %212, %211 : vector<8x128xf32>
    %cst_75 = arith.constant 5.000000e-01 : f32
    %214 = vector.broadcast %cst_75 : f32 to vector<8x128xf32>
    %215 = arith.addf %213, %214 : vector<8x128xf32>
    %216 = vector.extract_strided_slice %199 {offsets = [0, 256], sizes = [8, 128], strides = [1, 1]} : vector<8x512xf32> to vector<8x128xf32>
    %217 = math.tanh %216 : vector<8x128xf32>
    %218 = vector.extract_strided_slice %199 {offsets = [0, 384], sizes = [8, 128], strides = [1, 1]} : vector<8x512xf32> to vector<8x128xf32>
    %cst_76 = arith.constant 5.000000e-01 : f32
    %219 = vector.broadcast %cst_76 : f32 to vector<8x128xf32>
    %220 = arith.mulf %219, %218 : vector<8x128xf32>
    %221 = math.tanh %220 : vector<8x128xf32>
    %cst_77 = arith.constant 5.000000e-01 : f32
    %222 = vector.broadcast %cst_77 : f32 to vector<8x128xf32>
    %223 = arith.mulf %222, %221 : vector<8x128xf32>
    %cst_78 = arith.constant 5.000000e-01 : f32
    %224 = vector.broadcast %cst_78 : f32 to vector<8x128xf32>
    %225 = arith.addf %223, %224 : vector<8x128xf32>
    %226 = arith.mulf %215, %191 : vector<8x128xf32>
    %227 = arith.mulf %207, %217 : vector<8x128xf32>
    %228 = arith.addf %226, %227 : vector<8x128xf32>
    %229 = math.tanh %228 : vector<8x128xf32>
    %230 = arith.mulf %225, %229 : vector<8x128xf32>
    %231 = vector.extract_strided_slice %230 {offsets = [0, 0], sizes = [2, 32], strides = [1, 1]} : vector<8x128xf32> to vector<2x32xf32>
    %232 = vector.shape_cast %231 : vector<2x32xf32> to vector<2x1x32xf32>
    %c0_79 = arith.constant 0 : index
    %c1 = arith.constant 1 : index
    %c0_80 = arith.constant 0 : index
    %233 = vector.load %arg5[%c0_79, %c1, %c0_80] : memref<2x8x32xf32, #tpu.memory_space<vmem>>, vector<2x1x32xf32>
    tpu.vector_store %arg5[%c0_79, %c1, %c0_80], %232 {strides = array<i32>} : memref<2x8x32xf32, #tpu.memory_space<vmem>>, vector<2x1x32xf32>,
    %234 = arith.truncf %230 : vector<8x128xf32> to vector<8x128xbf16>
    %cst_81 = arith.constant dense<0.000000e+00> : vector<8x512xf32>
    %235 = tpu.matmul %234, %3, %cst_81 {dimension_numbers = #tpu.dot_dimension_numbers<[1], [0], [0], [1], [0, 0, 1, 1], [], []>} : vector<8x128xbf16>, vector<128x512xbf16>, vector<8x512xf32> -> vector<8x512xf32>
    %236 = arith.addf %235, %6 : vector<8x512xf32>
    %237 = vector.extract_strided_slice %236 {offsets = [0, 0], sizes = [8, 128], strides = [1, 1]} : vector<8x512xf32> to vector<8x128xf32>
    %cst_82 = arith.constant 5.000000e-01 : f32
    %238 = vector.broadcast %cst_82 : f32 to vector<8x128xf32>
    %239 = arith.mulf %238, %237 : vector<8x128xf32>
    %240 = math.tanh %239 : vector<8x128xf32>
    %cst_83 = arith.constant 5.000000e-01 : f32
    %241 = vector.broadcast %cst_83 : f32 to vector<8x128xf32>
    %242 = arith.mulf %241, %240 : vector<8x128xf32>
    %cst_84 = arith.constant 5.000000e-01 : f32
    %243 = vector.broadcast %cst_84 : f32 to vector<8x128xf32>
    %244 = arith.addf %242, %243 : vector<8x128xf32>
    %245 = vector.extract_strided_slice %236 {offsets = [0, 128], sizes = [8, 128], strides = [1, 1]} : vector<8x512xf32> to vector<8x128xf32>
    %cst_85 = arith.constant 5.000000e-01 : f32
    %246 = vector.broadcast %cst_85 : f32 to vector<8x128xf32>
    %247 = arith.mulf %246, %245 : vector<8x128xf32>
    %248 = math.tanh %247 : vector<8x128xf32>
    %cst_86 = arith.constant 5.000000e-01 : f32
    %249 = vector.broadcast %cst_86 : f32 to vector<8x128xf32>
    %250 = arith.mulf %249, %248 : vector<8x128xf32>
    %cst_87 = arith.constant 5.000000e-01 : f32
    %251 = vector.broadcast %cst_87 : f32 to vector<8x128xf32>
    %252 = arith.addf %250, %251 : vector<8x128xf32>
    %253 = vector.extract_strided_slice %236 {offsets = [0, 256], sizes = [8, 128], strides = [1, 1]} : vector<8x512xf32> to vector<8x128xf32>
    %254 = math.tanh %253 : vector<8x128xf32>
    %255 = vector.extract_strided_slice %236 {offsets = [0, 384], sizes = [8, 128], strides = [1, 1]} : vector<8x512xf32> to vector<8x128xf32>
    %cst_88 = arith.constant 5.000000e-01 : f32
    %256 = vector.broadcast %cst_88 : f32 to vector<8x128xf32>
    %257 = arith.mulf %256, %255 : vector<8x128xf32>
    %258 = math.tanh %257 : vector<8x128xf32>
    %cst_89 = arith.constant 5.000000e-01 : f32
    %259 = vector.broadcast %cst_89 : f32 to vector<8x128xf32>
    %260 = arith.mulf %259, %258 : vector<8x128xf32>
    %cst_90 = arith.constant 5.000000e-01 : f32
    %261 = vector.broadcast %cst_90 : f32 to vector<8x128xf32>
    %262 = arith.addf %260, %261 : vector<8x128xf32>
    %263 = arith.mulf %252, %228 : vector<8x128xf32>
    %264 = arith.mulf %244, %254 : vector<8x128xf32>
    %265 = arith.addf %263, %264 : vector<8x128xf32>
    %266 = math.tanh %265 : vector<8x128xf32>
    %267 = arith.mulf %262, %266 : vector<8x128xf32>
    %268 = vector.extract_strided_slice %267 {offsets = [0, 0], sizes = [2, 32], strides = [1, 1]} : vector<8x128xf32> to vector<2x32xf32>
    %269 = vector.shape_cast %268 : vector<2x32xf32> to vector<2x1x32xf32>
    %c0_91 = arith.constant 0 : index
    %c0_92 = arith.constant 0 : index
    %c0_93 = arith.constant 0 : index
    %270 = vector.load %arg5[%c0_91, %c0_92, %c0_93] : memref<2x8x32xf32, #tpu.memory_space<vmem>>, vector<2x1x32xf32>
    tpu.vector_store %arg5[%c0_91, %c0_92, %c0_93], %269 {strides = array<i32>} : memref<2x8x32xf32, #tpu.memory_space<vmem>>, vector<2x1x32xf32>,
    %271 = arith.truncf %267 : vector<8x128xf32> to vector<8x128xbf16>
    %cst_94 = arith.constant dense<0.000000e+00> : vector<8x512xf32>
    %272 = tpu.matmul %271, %3, %cst_94 {dimension_numbers = #tpu.dot_dimension_numbers<[1], [0], [0], [1], [0, 0, 1, 1], [], []>} : vector<8x128xbf16>, vector<128x512xbf16>, vector<8x512xf32> -> vector<8x512xf32>
    %273 = arith.addf %272, %6 : vector<8x512xf32>
    %274 = vector.extract_strided_slice %273 {offsets = [0, 0], sizes = [8, 128], strides = [1, 1]} : vector<8x512xf32> to vector<8x128xf32>
    %cst_95 = arith.constant 5.000000e-01 : f32
    %275 = vector.broadcast %cst_95 : f32 to vector<8x128xf32>
    %276 = arith.mulf %275, %274 : vector<8x128xf32>
    %277 = math.tanh %276 : vector<8x128xf32>
    %cst_96 = arith.constant 5.000000e-01 : f32
    %278 = vector.broadcast %cst_96 : f32 to vector<8x128xf32>
    %279 = arith.mulf %278, %277 : vector<8x128xf32>
    %cst_97 = arith.constant 5.000000e-01 : f32
    %280 = vector.broadcast %cst_97 : f32 to vector<8x128xf32>
    %281 = arith.addf %279, %280 : vector<8x128xf32>
    %282 = vector.extract_strided_slice %273 {offsets = [0, 128], sizes = [8, 128], strides = [1, 1]} : vector<8x512xf32> to vector<8x128xf32>
    %cst_98 = arith.constant 5.000000e-01 : f32
    %283 = vector.broadcast %cst_98 : f32 to vector<8x128xf32>
    %284 = arith.mulf %283, %282 : vector<8x128xf32>
    %285 = math.tanh %284 : vector<8x128xf32>
    %cst_99 = arith.constant 5.000000e-01 : f32
    %286 = vector.broadcast %cst_99 : f32 to vector<8x128xf32>
    %287 = arith.mulf %286, %285 : vector<8x128xf32>
    %cst_100 = arith.constant 5.000000e-01 : f32
    %288 = vector.broadcast %cst_100 : f32 to vector<8x128xf32>
    %289 = arith.addf %287, %288 : vector<8x128xf32>
    %290 = vector.extract_strided_slice %273 {offsets = [0, 256], sizes = [8, 128], strides = [1, 1]} : vector<8x512xf32> to vector<8x128xf32>
    %291 = math.tanh %290 : vector<8x128xf32>
    %292 = vector.extract_strided_slice %273 {offsets = [0, 384], sizes = [8, 128], strides = [1, 1]} : vector<8x512xf32> to vector<8x128xf32>
    %cst_101 = arith.constant 5.000000e-01 : f32
    %293 = vector.broadcast %cst_101 : f32 to vector<8x128xf32>
    %294 = arith.mulf %293, %292 : vector<8x128xf32>
    %295 = math.tanh %294 : vector<8x128xf32>
    %cst_102 = arith.constant 5.000000e-01 : f32
    %296 = vector.broadcast %cst_102 : f32 to vector<8x128xf32>
    %297 = arith.mulf %296, %295 : vector<8x128xf32>
    %cst_103 = arith.constant 5.000000e-01 : f32
    %298 = vector.broadcast %cst_103 : f32 to vector<8x128xf32>
    %299 = arith.addf %297, %298 : vector<8x128xf32>
    %300 = arith.mulf %289, %265 : vector<8x128xf32>
    %301 = arith.mulf %281, %291 : vector<8x128xf32>
    %302 = arith.addf %300, %301 : vector<8x128xf32>
    %303 = math.tanh %302 : vector<8x128xf32>
    %304 = arith.mulf %299, %303 : vector<8x128xf32>
    %c0_104 = arith.constant 0 : index
    %c0_105 = arith.constant 0 : index
    %305 = vector.load %arg6[%c0_104, %c0_105] : memref<8x128xf32, #tpu.memory_space<vmem>>, vector<8x128xf32>
    tpu.vector_store %arg6[%c0_104, %c0_105], %304 {strides = array<i32>} : memref<8x128xf32, #tpu.memory_space<vmem>>, vector<8x128xf32>,
    %c0_106 = arith.constant 0 : index
    %c0_107 = arith.constant 0 : index
    %306 = vector.load %arg7[%c0_106, %c0_107] : memref<8x128xf32, #tpu.memory_space<vmem>>, vector<8x128xf32>
    tpu.vector_store %arg7[%c0_106, %c0_107], %302 {strides = array<i32>} : memref<8x128xf32, #tpu.memory_space<vmem>>, vector<8x128xf32>,
    return
  }
  func.func @transform_0(%arg0: i32) -> (i32, i32) {
    %c0_i32 = arith.constant 0 : i32
    %c0_i32_0 = arith.constant 0 : i32
    %c0_i32_1 = arith.constant 0 : i32
    return %c0_i32, %c0_i32_0 : i32, i32
  }
  func.func @transform_1(%arg0: i32) -> (i32, i32) {
    %c0_i32 = arith.constant 0 : i32
    %c0_i32_0 = arith.constant 0 : i32
    %c0_i32_1 = arith.constant 0 : i32
    return %c0_i32, %c0_i32_0 : i32, i32
  }
  func.func @transform_2(%arg0: i32) -> (i32, i32) {
    %c0_i32 = arith.constant 0 : i32
    %c0_i32_0 = arith.constant 0 : i32
    %c0_i32_1 = arith.constant 0 : i32
    return %c0_i32, %c0_i32_0 : i32, i32
  }
  func.func @transform_3(%arg0: i32) -> (i32, i32) {
    %c0_i32 = arith.constant 0 : i32
    %c0_i32_0 = arith.constant 0 : i32
    %c0_i32_1 = arith.constant 0 : i32
    return %c0_i32, %c0_i32_0 : i32, i32
  }
  func.func @transform_4(%arg0: i32) -> (i32, i32, i32) {
    %c0_i32 = arith.constant 0 : i32
    %0 = arith.subi %c0_i32, %arg0 : i32
    %c0_i32_0 = arith.constant 0 : i32
    %c0_i32_1 = arith.constant 0 : i32
    %c0_i32_2 = arith.constant 0 : i32
    return %c0_i32_0, %0, %c0_i32_1 : i32, i32, i32
  }
}

</mosaic_0001>

<bundles_post_ra>
// kernel: tpu_custom_call.1
= control target key start
LH: loop header
LB: loop body
LE: loop exit
PB: predicated region body
PF: predicated region fallthrough
CT: control target
= control target key end

     0   :  { %9 = vsyncpa [#allocation5], 0  ;;  %s2072_s0 = inlined_call_operand.hbm [shape: f32[8,128], index: 0, kind: input, shape index: {}]   ;;  %s2073_s1 = inlined_call_operand.hbm [shape: f32[8,128], index: 1, kind: input, shape index: {}]   ;;  %s2074_s2 = inlined_call_operand.hbm [shape: bf16[128,512], index: 2, kind: input, shape index: {}]   ;;  %s2075_s3 = inlined_call_operand.vmem [shape: f32[1,512], index: 3, kind: input, shape index: {}]   ;;  %s2076_s4 = inlined_call_operand.hbm [shape: f32[2,8,32], index: 4, kind: output, shape index: {}]  }
   0x1   :  { %10 = vsyncpa [#allocation8], 0 }
   0x2   :  { %11 = vsyncpa [#allocation6], 0  ;;  %s1609_s15 = smov [#allocation7]   ;;  %s1610_s17 = smov [#allocation4]  }
   0x3   :  { %s28_s16 = sshll.u32 %s1609_s15, 4  ;;  %s18_s18 = sshll.u32 %s1610_s17, 4  ;;  %s29_s16 = int_to_ptr.vmem [resolvable:$true] %s28_s16  ;;  %s19_s18 = int_to_ptr.vmem [resolvable:$true] %s18_s18 }
   0x4   :  { %s1531_s19 = scalar_lea.vmem %s29_s16, 128  ;;  %p1536_p1 = scmp.lt.s32.totalorder %s29_s16, %s29_s16 }
   0x5   :  { %p1532_p0 = scmp.ne.s32.totalorder %s29_s16, %s1531_s19  ;;  %p1537_p2 = scmp.lt.s32.totalorder %s1531_s19, %s1531_s19 }
   0x7   :  { %p1538_p3 = por %p1537_p2, %p1536_p1 }
   0x9   :  { %p1539_p4 = pnand %p1538_p3, %p1532_p0 }
   0xb   :  { %1542 = shalt.err (!%p1539_p4)
}
   0xc   :  { %31 = dma.hbm_to_vmem [thread:$0]  %s2073_s1, 128, %s29_s16, [#allocation8]  }
   0xd   :  { %s1551_s22 = scalar_lea.vmem %s19_s18, 128  ;;  %p1556_p6 = scmp.lt.s32.totalorder %s19_s18, %s19_s18 }
   0xe   :  { %p1552_p5 = scmp.ne.s32.totalorder %s19_s18, %s1551_s22  ;;  %p1557_p7 = scmp.lt.s32.totalorder %s1551_s22, %s1551_s22 }
  0x10   :  { %p1558_p8 = por %p1557_p7, %p1556_p6 }
  0x12   :  { %p1559_p9 = pnand %p1558_p8, %p1552_p5 }
  0x14   :  { %1562 = shalt.err (!%p1559_p9)
}
  0x15   :  { %21 = dma.hbm_to_vmem [thread:$0]  %s2072_s0, 128, %s19_s18, [#allocation5]  }
  0x16   :  { %s1611_s25 = smov [#allocation9]  }
  0x17   :  { %s37_s26 = sshll.u32 %s1611_s25, 4  ;;  %s38_s26 = int_to_ptr.vmem [resolvable:$true] %s37_s26 }
  0x18   :  { %s1571_s27 = scalar_lea.vmem %s38_s26, 4096  ;;  %p1576_p11 = scmp.lt.s32.totalorder %s38_s26, %s38_s26 }
  0x19   :  { %p1572_p10 = scmp.ne.s32.totalorder %s38_s26, %s1571_s27  ;;  %p1577_p12 = scmp.lt.s32.totalorder %s1571_s27, %s1571_s27 }
  0x1b   :  { %p1578_p13 = por %p1577_p12, %p1576_p11 }
  0x1d   :  { %p1579_p0 = pnand %p1578_p13, %p1572_p10 }
  0x1f   :  { %1582 = shalt.err (!%p1579_p0)
}
  0x20   :  { %s1612_s1 = smov 256   ;;  %s1613_s28 = smov 16  }
  0x21   :  { %43 = dma.hbm_to_vmem [thread:$0]  %s2074_s2, 4096, %s38_s26, [#allocation8], %s1612_s1, %s1612_s1, %s1613_s28  }
  0x22   :  { %1603 = dma.done.wait [#allocation5], 128  }
  0x23   :  { %1604 = vsyncadd [#allocation5], 4294967168 }
  0x24   :  { %1605 = dma.done.wait [#allocation8], 4224  }
  0x25   :  { %1606 = vsyncadd [#allocation8], 4294963072  ;;  %v1614_v0 = vmov 0   ;;  %v1655_v1 = vld [vmem:[#allocation9 + $0xe4] ss:$16 sps:$4 sm:$0xff]   ;;  %v99_v21 = vlaneseq  ;;  %vm146_vm0 = vcmask 253952  }
  0x26   :  { %342 = vmatprep.mubr.bf16.mxu0 %v1614_v0  ;;  %383 = vmatprep.mubr.bf16.mxu1 %v1614_v0  ;;  %v1657_v2 = vld [vmem:[#allocation9 + $0xe0] ss:$16 sps:$4 sm:$0xff]   ;;  %v1660_v3 = vld [vmem:[#allocation9 + $0xec] ss:$16 sps:$4 sm:$0xff]   ;;  %v1662_v4 = vld [vmem:[#allocation9 + $0xe8] ss:$16 sps:$4 sm:$0xff]  }
  0x27   :  { %310 = vmatprep.subr.bf16.mxu0 %v1655_v1  ;;  %v1665_v5 = vld [vmem:[#allocation9 + $0xc4] ss:$16 sps:$4 sm:$0xff]   ;;  %v1667_v6 = vld [vmem:[#allocation9 + $0xc0] ss:$16 sps:$4 sm:$0xff]   ;;  %351 = vmatprep.subr.bf16.mxu1 %v1660_v3  ;;  %v1670_v7 = vld [vmem:[#allocation9 + $0xcc] ss:$16 sps:$4 sm:$0xff]  }
  0x28   :  { %311 = vmatpush1.bf16.msra.mxu0 %v1657_v2  ;;  %352 = vmatpush1.bf16.msra.mxu1 %v1662_v4  ;;  %v1674_v8 = vld [vmem:[#allocation9 + $0xc8] ss:$16 sps:$4 sm:$0xff]   ;;  %v1677_v9 = vld [vmem:[#allocation9 + $0xa4] ss:$16 sps:$4 sm:$0xff]   ;;  %v1680_v10 = vld [vmem:[#allocation9 + $0xa0] ss:$16 sps:$4 sm:$0xff]  }
  0x29   :  { %312 = vmatprep.subr.bf16.mxu0 %v1665_v5  ;;  %353 = vmatprep.subr.bf16.mxu1 %v1670_v7  ;;  %v1682_v11 = vld [vmem:[#allocation9 + $0xac] ss:$16 sps:$4 sm:$0xff]   ;;  %v1685_v12 = vld [vmem:[#allocation9 + $0x84] ss:$16 sps:$4 sm:$0xff]   ;;  %v1688_v13 = vld [vmem:[#allocation9 + $0xa8] ss:$16 sps:$4 sm:$0xff]  }
  0x2a   :  { %v1691_v14 = vld [vmem:[#allocation9 + $0x8c] ss:$16 sps:$4 sm:$0xff]   ;;  %v1694_v15 = vld [vmem:[#allocation9 + $0x80] ss:$16 sps:$4 sm:$0xff]   ;;  %v1697_v16 = vld [vmem:[#allocation9 + $0x64] ss:$16 sps:$4 sm:$0xff]  }
  0x2b   :  { %v1615_v17 = vmov 1966171168   ;;  %v1700_v19 = vld [vmem:[#allocation9 + $0x88] ss:$16 sps:$4 sm:$0xff]   ;;  %v1703_v20 = vld [vmem:[#allocation9 + $0x6c] ss:$16 sps:$4 sm:$0xff]  }
  0x2c   :  { %313 = vmatpush1.bf16.msra.mxu0 %v1667_v6  ;;  %354 = vmatpush1.bf16.msra.mxu1 %v1674_v8  ;;  %v123_v18 = vunpack.c.l.s4 %v1615_v17  ;;  %v1706_v22 = vld [vmem:[#allocation9 + $0x60] ss:$16 sps:$4 sm:$0xff]   ;;  %v1709_v23 = vld [vmem:[#allocation9 + $0x44] ss:$16 sps:$4 sm:$0xff]   ;;  %v1712_v25 = vld [vmem:[#allocation9 + $0x68] ss:$16 sps:$4 sm:$0xff]  }
  0x2d   :  { %314 = vmatprep.subr.bf16.mxu0 %v1677_v9  ;;  %355 = vmatprep.subr.bf16.mxu1 %v1682_v11  ;;  %v1715_v26 = vld [vmem:[#allocation9 + $0x4c] ss:$16 sps:$4 sm:$0xff]   ;;  %v1717_v27 = vshrl.u32 %v99_v21, 7  ;;  %v1720_v28 = vld [vmem:[#allocation9 + $0x40] ss:$16 sps:$4 sm:$0xff]  }
  0x2e   :  { %v124_v24 = vunpack.c.0.s8 %v123_v18  ;;  %v1723_v29 = vld [vmem:[#allocation9 + $0x24] ss:$16 sps:$4 sm:$0xff]   ;;  %v1729_v31 = vld [vmem:[#allocation9 + $0x48] ss:$16 sps:$4 sm:$0xff]   ;;  %v1732_v33 = vld [vmem:[#allocation9 + $0x2c] ss:$16 sps:$4 sm:$0xff]  }
  0x2f   :  { %v61_v32 = vld [vmem:[#allocation4] sm:$0xff]  ;;  %v1743_v39 = vld [vmem:[#allocation9 + $0x28] ss:$16 sps:$4 sm:$0xff]   ;;  %v1746_v40 = vld [vmem:[#allocation9 + $0xc] ss:$16 sps:$4 sm:$0xff]   ;;  %v101_v45 = vsub.s32 0, %v1717_v27 }
  0x30   :  { %315 = vmatpush1.bf16.msra.mxu0 %v1680_v10  ;;  %356 = vmatpush1.bf16.msra.mxu1 %v1688_v13  ;;  %v1726_v30 = vsub.s32 %v124_v24, %v1717_v27  ;;  %v1736_v35 = vld [vmem:[#allocation9 + $0x20] ss:$16 sps:$4 sm:$0xff]   ;;  %v1739_v36 = vld [vmem:[#allocation9 + $0x4] ss:$16 sps:$4 sm:$0xff]   ;;  %v1756_v43 = vld [vmem:[#allocation9 + $0x8] ss:$16 sps:$4 sm:$0xff]   ;;  %v149_v44 = vpack.c.bf16 %v61_v32, %v61_v32 }
  0x31   :  { %316 = vmatprep.subr.bf16.mxu0 %v1685_v12  ;;  %357 = vmatprep.subr.bf16.mxu1 %v1691_v14  ;;  %v1751_v42 = vld [vmem:[#allocation9] ss:$16 sps:$4 sm:$0xff]   ;;  %v105_v47 = vsub.s32 1, %v1717_v27  ;;  %v109_v49 = vsub.s32 2, %v1717_v27  ;;  %v113_v62 = vsub.s32 3, %v1717_v27 }
  0x32   :  { %v128_v34 = vrot.slane %v61_v32, %v1726_v30  ;;  %v97_v46 = vld [vmem:[%s2075_s3] sm:$0xf]  ;;  %s1616_s3 = smov [#allocation10]  }
  0x33   :  { %v1802_v48 = vrot.slane %v97_v46, %v101_v45  ;;  %v1805_v50 = vrot.slane %v97_v46, %v105_v47  ;;  %v1808_v53 = vrot.slane %v97_v46, %v109_v49  ;;  %v1813_v21 = vrot.slane %v97_v46, %v113_v62  ;;  %v63_v47 = vld [vmem:[#allocation7] sm:$0xff]  ;;  %s1316_s5 = sshll.u32 %s1616_s3, 4  ;;  %s1317_s5 = int_to_ptr.vmem [resolvable:$true] %s1316_s5 }
  0x34   :  { %317 = vmatpush1.bf16.msra.mxu0 %v1694_v15  ;;  %358 = vmatpush1.bf16.msra.mxu1 %v1700_v19  ;;  %v129_v37 = vcombine.high %v128_v34, %v128_v34  ;;  %v136_v38 = vrot.slane %v128_v34, %v1726_v30  ;;  %s1583_s6 = scalar_lea.vmem %s1317_s5, 256  ;;  %p1588_p2 = scmp.lt.s32.totalorder %s1317_s5, %s1317_s5 }
  0x35   :  { %318 = vmatprep.subr.bf16.mxu0 %v1697_v16  ;;  %359 = vmatprep.subr.bf16.mxu1 %v1703_v20  ;;  %p1584_p1 = scmp.ne.s32.totalorder %s1317_s5, %s1583_s6  ;;  %p1589_p3 = scmp.lt.s32.totalorder %s1583_s6, %s1583_s6 }
  0x36   :  { %v143_v41 = vrot.slane %v129_v37, %v1726_v30  ;;  %147 = vst.msk [vmem:[#allocation10 + $0x7] sm:$0x1] %vm146_vm0, %v136_v38 }
  0x37   :  { %p1590_p4 = por %p1589_p3, %p1588_p2 }
  0x38   :  { %319 = vmatpush1.bf16.msra.mxu0 %v1706_v22  ;;  %360 = vmatpush1.bf16.msra.mxu1 %v1712_v25  ;;  %148 = vst.msk [vmem:[#allocation10 + $0xf] sm:$0x1] %vm146_vm0, %v143_v41 }
  0x39   :  { %320 = vmatprep.subr.bf16.mxu0 %v1709_v23  ;;  %361 = vmatprep.subr.bf16.mxu1 %v1715_v26  ;;  %p1591_p5 = pnand %p1590_p4, %p1584_p1 }
  0x3c   :  { %321 = vmatpush1.bf16.msra.mxu0 %v1720_v28  ;;  %362 = vmatpush1.bf16.msra.mxu1 %v1729_v31 }
  0x3d   :  { %322 = vmatprep.subr.bf16.mxu0 %v1723_v29  ;;  %363 = vmatprep.subr.bf16.mxu1 %v1732_v33 }
  0x40   :  { %323 = vmatpush1.bf16.msra.mxu0 %v1736_v35  ;;  %364 = vmatpush1.bf16.msra.mxu1 %v1743_v39 }
  0x41   :  { %324 = vmatprep.subr.bf16.mxu0 %v1739_v36  ;;  %365 = vmatprep.subr.bf16.mxu1 %v1746_v40 }
  0x44   :  { %325 = vmatpush1.bf16.msra.mxu0 %v1751_v42  ;;  %366 = vmatpush1.bf16.msra.mxu1 %v1756_v43 }
  0x45   :  { %438 = vmatprep.subr.bf16.mxu0 %v1655_v1  ;;  %479 = vmatprep.subr.bf16.mxu1 %v1660_v3 }
  0x47   :  { %343 = vmatmul.mubr.bf16.vlgmr.msra.gmra.mxu0 %v149_v44  ;;  %384 = vmatmul.mubr.bf16.vlgmr.msra.gmra.mxu1 %v149_v44 }
  0x48   :  { %439 = vmatpush1.bf16.msra.mxu0 %v1657_v2  ;;  %470 = vmatprep.mubr.bf16.mxu0 %v1614_v0 }
  0x49   :  { %440 = vmatprep.subr.bf16.mxu0 %v1665_v5  ;;  %480 = vmatpush1.bf16.msra.mxu1 %v1662_v4 }
  0x4a   :  { %511 = vmatprep.mubr.bf16.mxu1 %v1614_v0  ;;  %481 = vmatprep.subr.bf16.mxu1 %v1670_v7 }
  0x4c   :  { %441 = vmatpush1.bf16.msra.mxu0 %v1667_v6 }
  0x4d   :  { %442 = vmatprep.subr.bf16.mxu0 %v1677_v9  ;;  %482 = vmatpush1.bf16.msra.mxu1 %v1674_v8 }
  0x4e   :  { %483 = vmatprep.subr.bf16.mxu1 %v1682_v11 }
  0x50   :  { %443 = vmatpush1.bf16.msra.mxu0 %v1680_v10 }
  0x51   :  { %444 = vmatprep.subr.bf16.mxu0 %v1685_v12  ;;  %484 = vmatpush1.bf16.msra.mxu1 %v1688_v13 }
  0x52   :  { %485 = vmatprep.subr.bf16.mxu1 %v1691_v14 }
  0x54   :  { %445 = vmatpush1.bf16.msra.mxu0 %v1694_v15 }
  0x55   :  { %446 = vmatprep.subr.bf16.mxu0 %v1697_v16  ;;  %486 = vmatpush1.bf16.msra.mxu1 %v1700_v19 }
  0x56   :  { %487 = vmatprep.subr.bf16.mxu1 %v1703_v20 }
  0x58   :  { %447 = vmatpush1.bf16.msra.mxu0 %v1706_v22 }
  0x59   :  { %448 = vmatprep.subr.bf16.mxu0 %v1709_v23  ;;  %488 = vmatpush1.bf16.msra.mxu1 %v1712_v25 }
  0x5a   :  { %489 = vmatprep.subr.bf16.mxu1 %v1715_v26 }
  0x5c   :  { %449 = vmatpush1.bf16.msra.mxu0 %v1720_v28 }
  0x5d   :  { %450 = vmatprep.subr.bf16.mxu0 %v1723_v29  ;;  %490 = vmatpush1.bf16.msra.mxu1 %v1729_v31 }
  0x5e   :  { %491 = vmatprep.subr.bf16.mxu1 %v1732_v33 }
  0x60   :  { %451 = vmatpush1.bf16.msra.mxu0 %v1736_v35 }
  0x61   :  { %452 = vmatprep.subr.bf16.mxu0 %v1739_v36  ;;  %492 = vmatpush1.bf16.msra.mxu1 %v1743_v39 }
  0x62   :  { %493 = vmatprep.subr.bf16.mxu1 %v1746_v40 }
  0x64   :  { %453 = vmatpush1.bf16.msra.mxu0 %v1751_v42 }
  0x65   :  { %566 = vmatprep.subr.bf16.mxu0 %v1655_v1  ;;  %494 = vmatpush1.bf16.msra.mxu1 %v1756_v43 }
  0x66   :  { %607 = vmatprep.subr.bf16.mxu1 %v1660_v3 }
 0x107   :  { %v344_v51 = vpop.f32.mrf.mxu0  ;;  %v385_v55 = vpop.f32.mrf.mxu1 }
 0x108   :  { %v345_v52 = vadd.f32 %v344_v51, %v1802_v48  ;;  %v386_v61 = vadd.f32 %v385_v55, %v1808_v53 }
 0x109   :  { %v346_v54 = vpop.f32.mrf.mxu0  ;;  %v387_v59 = vpop.f32.mrf.mxu1 }
 0x10a   :  { %v392_v56 = vmul.f32 0.5, %v345_v52  ;;  %v347_v57 = vadd.f32 %v346_v54, %v1805_v50  ;;  %v388_v24 = vadd.f32 %v387_v59, %v1813_v21 }
 0x10b   :  { %v348_v58 = vpop.f32.mrf.mxu0  ;;  %v389_v17 = vpop.f32.mrf.mxu1 }
 0x10c   :  { %1421 = vtanh.f32 %v392_v56  ;;  %v396_v60 = vmul.f32 0.5, %v347_v57  ;;  %v401_v32 = vmul.f32 0.5, %v388_v24 }
 0x10d   :  { %v349_v63 = vpop.f32.mrf.mxu0  ;;  %v390_v18 = vpop.f32.mrf.mxu1 }
 0x10e   :  { %1423 = vtanh.f32 %v396_v60 }
 0x10f   :  { %1425 = vtanh.f32 %v386_v61 }
 0x110   :  { %1427 = vtanh.f32 %v401_v32 }
 0x119   :  { %v1422_v34 = vpop.eup %1421 }
 0x11a   :  { %v394_v37 = vmul.f32 0.5, %v1422_v34 }
 0x11b   :  { %v1424_v38 = vpop.eup %1423 }
 0x11c   :  { %v395_v41 = vadd.f32 0.5, %v394_v37  ;;  %v398_v44 = vmul.f32 0.5, %v1424_v38  ;;  %v1426_v45 = vpop.eup %1425 }
 0x11d   :  { %v1428_v46 = vpop.eup %1427 }
 0x11e   :  { %v399_v49 = vadd.f32 0.5, %v398_v44  ;;  %v406_v51 = vmul.f32 %v1426_v45, %v395_v41  ;;  %v403_v54 = vmul.f32 0.5, %v1428_v46 }
 0x120   :  { %v405_v27 = vmul.f32 %v399_v49, %v63_v47  ;;  %v404_v55 = vadd.f32 0.5, %v403_v54 }
 0x122   :  { %v1816_v52 = vadd.f32 %v406_v51, %v405_v27 }
 0x124   :  { %1429 = vtanh.f32 %v1816_v52 }
 0x131   :  { %v1430_v56 = vpop.eup %1429 }
 0x132   :  { %v409_v57 = vmul.f32 %v1430_v56, %v404_v55 }
 0x134   :  { %v417_v58 = vrot.slane %v409_v57, %v1726_v30  ;;  %v437_v59 = vpack.c.bf16 %v409_v57, %v409_v57 }
 0x136   :  { %v418_v60 = vcombine.high %v417_v58, %v417_v58  ;;  %v425_v61 = vrot.slane %v417_v58, %v1726_v30  ;;  %471 = vmatmul.mubr.bf16.vlgmr.msra.gmra.mxu0 %v437_v59  ;;  %512 = vmatmul.mubr.bf16.vlgmr.msra.gmra.mxu1 %v437_v59 }
 0x137   :  { %567 = vmatpush1.bf16.msra.mxu0 %v1657_v2  ;;  %608 = vmatpush1.bf16.msra.mxu1 %v1662_v4 }
 0x138   :  { %v432_v62 = vrot.slane %v418_v60, %v1726_v30  ;;  %435 = vst.msk [vmem:[#allocation10 + $0x6] sm:$0x1] %vm146_vm0, %v425_v61  ;;  %568 = vmatprep.subr.bf16.mxu0 %v1665_v5  ;;  %609 = vmatprep.subr.bf16.mxu1 %v1670_v7 }
 0x139   :  { %598 = vmatprep.mubr.bf16.mxu0 %v1614_v0  ;;  %639 = vmatprep.mubr.bf16.mxu1 %v1614_v0 }
 0x13a   :  { %436 = vst.msk [vmem:[#allocation10 + $0xe] sm:$0x1] %vm146_vm0, %v432_v62 }
 0x13b   :  { %569 = vmatpush1.bf16.msra.mxu0 %v1667_v6  ;;  %610 = vmatpush1.bf16.msra.mxu1 %v1674_v8 }
 0x13c   :  { %570 = vmatprep.subr.bf16.mxu0 %v1677_v9  ;;  %611 = vmatprep.subr.bf16.mxu1 %v1682_v11 }
 0x13f   :  { %571 = vmatpush1.bf16.msra.mxu0 %v1680_v10  ;;  %612 = vmatpush1.bf16.msra.mxu1 %v1688_v13 }
 0x140   :  { %572 = vmatprep.subr.bf16.mxu0 %v1685_v12  ;;  %613 = vmatprep.subr.bf16.mxu1 %v1691_v14 }
 0x143   :  { %573 = vmatpush1.bf16.msra.mxu0 %v1694_v15  ;;  %614 = vmatpush1.bf16.msra.mxu1 %v1700_v19 }
 0x144   :  { %574 = vmatprep.subr.bf16.mxu0 %v1697_v16  ;;  %615 = vmatprep.subr.bf16.mxu1 %v1703_v20 }
 0x147   :  { %575 = vmatpush1.bf16.msra.mxu0 %v1706_v22  ;;  %616 = vmatpush1.bf16.msra.mxu1 %v1712_v25 }
 0x148   :  { %576 = vmatprep.subr.bf16.mxu0 %v1709_v23  ;;  %617 = vmatprep.subr.bf16.mxu1 %v1715_v26 }
 0x14b   :  { %577 = vmatpush1.bf16.msra.mxu0 %v1720_v28  ;;  %618 = vmatpush1.bf16.msra.mxu1 %v1729_v31 }
 0x14c   :  { %578 = vmatprep.subr.bf16.mxu0 %v1723_v29  ;;  %619 = vmatprep.subr.bf16.mxu1 %v1732_v33 }
 0x14f   :  { %579 = vmatpush1.bf16.msra.mxu0 %v1736_v35  ;;  %620 = vmatpush1.bf16.msra.mxu1 %v1743_v39 }
 0x150   :  { %580 = vmatprep.subr.bf16.mxu0 %v1739_v36  ;;  %621 = vmatprep.subr.bf16.mxu1 %v1746_v40 }
 0x153   :  { %581 = vmatpush1.bf16.msra.mxu0 %v1751_v42  ;;  %622 = vmatpush1.bf16.msra.mxu1 %v1756_v43 }
 0x154   :  { %694 = vmatprep.subr.bf16.mxu0 %v1655_v1  ;;  %735 = vmatprep.subr.bf16.mxu1 %v1660_v3 }
 0x1f6   :  { %v472_v63 = vpop.f32.mrf.mxu0  ;;  %v513_v17 = vpop.f32.mrf.mxu1 }
 0x1f7   :  { %v473_v18 = vadd.f32 %v472_v63, %v1802_v48  ;;  %v514_v49 = vadd.f32 %v513_v17, %v1808_v53 }
 0x1f8   :  { %v474_v24 = vpop.f32.mrf.mxu0  ;;  %v515_v32 = vpop.f32.mrf.mxu1 }
 0x1f9   :  { %v520_v34 = vmul.f32 0.5, %v473_v18  ;;  %v475_v37 = vadd.f32 %v474_v24, %v1805_v50  ;;  %v516_v27 = vadd.f32 %v515_v32, %v1813_v21 }
 0x1fa   :  { %v476_v38 = vpop.f32.mrf.mxu0  ;;  %v517_v41 = vpop.f32.mrf.mxu1 }
 0x1fb   :  { %1431 = vtanh.f32 %v520_v34  ;;  %v524_v44 = vmul.f32 0.5, %v475_v37  ;;  %v529_v51 = vmul.f32 0.5, %v516_v27 }
 0x1fc   :  { %v477_v45 = vpop.f32.mrf.mxu0  ;;  %v518_v47 = vpop.f32.mrf.mxu1 }
 0x1fd   :  { %1433 = vtanh.f32 %v524_v44 }
 0x1fe   :  { %1435 = vtanh.f32 %v514_v49 }
 0x1ff   :  { %1437 = vtanh.f32 %v529_v51 }
 0x208   :  { %v1432_v46 = vpop.eup %1431 }
 0x209   :  { %v522_v54 = vmul.f32 0.5, %v1432_v46 }
 0x20a   :  { %v1434_v55 = vpop.eup %1433 }
 0x20b   :  { %v523_v56 = vadd.f32 0.5, %v522_v54  ;;  %v526_v57 = vmul.f32 0.5, %v1434_v55  ;;  %v1436_v59 = vpop.eup %1435 }
 0x20c   :  { %v1438_v63 = vpop.eup %1437 }
 0x20d   :  { %v527_v58 = vadd.f32 0.5, %v526_v57  ;;  %v534_v61 = vmul.f32 %v1436_v59, %v523_v56  ;;  %v531_v17 = vmul.f32 0.5, %v1438_v63 }
 0x20f   :  { %v533_v60 = vmul.f32 %v527_v58, %v1816_v52  ;;  %v532_v18 = vadd.f32 0.5, %v531_v17 }
 0x211   :  { %v1863_v62 = vadd.f32 %v534_v61, %v533_v60 }
 0x213   :  { %1439 = vtanh.f32 %v1863_v62 }
 0x220   :  { %v1440_v24 = vpop.eup %1439 }
 0x221   :  { %v537_v32 = vmul.f32 %v1440_v24, %v532_v18 }
 0x223   :  { %v545_v34 = vrot.slane %v537_v32, %v1726_v30  ;;  %v565_v37 = vpack.c.bf16 %v537_v32, %v537_v32 }
 0x225   :  { %v546_v38 = vcombine.high %v545_v34, %v545_v34  ;;  %v553_v41 = vrot.slane %v545_v34, %v1726_v30  ;;  %599 = vmatmul.mubr.bf16.vlgmr.msra.gmra.mxu0 %v565_v37  ;;  %640 = vmatmul.mubr.bf16.vlgmr.msra.gmra.mxu1 %v565_v37 }
 0x226   :  { %695 = vmatpush1.bf16.msra.mxu0 %v1657_v2  ;;  %736 = vmatpush1.bf16.msra.mxu1 %v1662_v4 }
 0x227   :  { %v560_v52 = vrot.slane %v546_v38, %v1726_v30  ;;  %563 = vst.msk [vmem:[#allocation10 + $0x5] sm:$0x1] %vm146_vm0, %v553_v41  ;;  %696 = vmatprep.subr.bf16.mxu0 %v1665_v5  ;;  %737 = vmatprep.subr.bf16.mxu1 %v1670_v7 }
 0x228   :  { %726 = vmatprep.mubr.bf16.mxu0 %v1614_v0  ;;  %767 = vmatprep.mubr.bf16.mxu1 %v1614_v0 }
 0x229   :  { %564 = vst.msk [vmem:[#allocation10 + $0xd] sm:$0x1] %vm146_vm0, %v560_v52 }
 0x22a   :  { %697 = vmatpush1.bf16.msra.mxu0 %v1667_v6  ;;  %738 = vmatpush1.bf16.msra.mxu1 %v1674_v8 }
 0x22b   :  { %698 = vmatprep.subr.bf16.mxu0 %v1677_v9  ;;  %739 = vmatprep.subr.bf16.mxu1 %v1682_v11 }
 0x22e   :  { %699 = vmatpush1.bf16.msra.mxu0 %v1680_v10  ;;  %740 = vmatpush1.bf16.msra.mxu1 %v1688_v13 }
 0x22f   :  { %700 = vmatprep.subr.bf16.mxu0 %v1685_v12  ;;  %741 = vmatprep.subr.bf16.mxu1 %v1691_v14 }
 0x232   :  { %701 = vmatpush1.bf16.msra.mxu0 %v1694_v15  ;;  %742 = vmatpush1.bf16.msra.mxu1 %v1700_v19 }
 0x233   :  { %702 = vmatprep.subr.bf16.mxu0 %v1697_v16  ;;  %743 = vmatprep.subr.bf16.mxu1 %v1703_v20 }
 0x236   :  { %703 = vmatpush1.bf16.msra.mxu0 %v1706_v22  ;;  %744 = vmatpush1.bf16.msra.mxu1 %v1712_v25 }
 0x237   :  { %704 = vmatprep.subr.bf16.mxu0 %v1709_v23  ;;  %745 = vmatprep.subr.bf16.mxu1 %v1715_v26 }
 0x23a   :  { %705 = vmatpush1.bf16.msra.mxu0 %v1720_v28  ;;  %746 = vmatpush1.bf16.msra.mxu1 %v1729_v31 }
 0x23b   :  { %706 = vmatprep.subr.bf16.mxu0 %v1723_v29  ;;  %747 = vmatprep.subr.bf16.mxu1 %v1732_v33 }
 0x23e   :  { %707 = vmatpush1.bf16.msra.mxu0 %v1736_v35  ;;  %748 = vmatpush1.bf16.msra.mxu1 %v1743_v39 }
 0x23f   :  { %708 = vmatprep.subr.bf16.mxu0 %v1739_v36  ;;  %749 = vmatprep.subr.bf16.mxu1 %v1746_v40 }
 0x242   :  { %709 = vmatpush1.bf16.msra.mxu0 %v1751_v42  ;;  %750 = vmatpush1.bf16.msra.mxu1 %v1756_v43 }
 0x243   :  { %822 = vmatprep.subr.bf16.mxu0 %v1655_v1  ;;  %863 = vmatprep.subr.bf16.mxu1 %v1660_v3 }
 0x2e5   :  { %v600_v44 = vpop.f32.mrf.mxu0  ;;  %v641_v45 = vpop.f32.mrf.mxu1 }
 0x2e6   :  { %v601_v47 = vadd.f32 %v600_v44, %v1802_v48  ;;  %v642_v59 = vadd.f32 %v641_v45, %v1808_v53 }
 0x2e7   :  { %v602_v49 = vpop.f32.mrf.mxu0  ;;  %v643_v27 = vpop.f32.mrf.mxu1 }
 0x2e8   :  { %v648_v51 = vmul.f32 0.5, %v601_v47  ;;  %v603_v46 = vadd.f32 %v602_v49, %v1805_v50  ;;  %v644_v60 = vadd.f32 %v643_v27, %v1813_v21 }
 0x2e9   :  { %v604_v54 = vpop.f32.mrf.mxu0  ;;  %v645_v55 = vpop.f32.mrf.mxu1 }
 0x2ea   :  { %1441 = vtanh.f32 %v648_v51  ;;  %v652_v56 = vmul.f32 0.5, %v603_v46  ;;  %v657_v61 = vmul.f32 0.5, %v644_v60 }
 0x2eb   :  { %v605_v57 = vpop.f32.mrf.mxu0  ;;  %v646_v58 = vpop.f32.mrf.mxu1 }
 0x2ec   :  { %1443 = vtanh.f32 %v652_v56 }
 0x2ed   :  { %1445 = vtanh.f32 %v642_v59 }
 0x2ee   :  { %1447 = vtanh.f32 %v657_v61 }
 0x2f7   :  { %v1442_v63 = vpop.eup %1441 }
 0x2f8   :  { %v650_v17 = vmul.f32 0.5, %v1442_v63 }
 0x2f9   :  { %v1444_v18 = vpop.eup %1443 }
 0x2fa   :  { %v651_v24 = vadd.f32 0.5, %v650_v17  ;;  %v654_v32 = vmul.f32 0.5, %v1444_v18  ;;  %v1446_v37 = vpop.eup %1445 }
 0x2fb   :  { %v1448_v44 = vpop.eup %1447 }
 0x2fc   :  { %v655_v34 = vadd.f32 0.5, %v654_v32  ;;  %v662_v41 = vmul.f32 %v1446_v37, %v651_v24  ;;  %v659_v45 = vmul.f32 0.5, %v1448_v44 }
 0x2fe   :  { %v661_v38 = vmul.f32 %v655_v34, %v1863_v62  ;;  %v660_v47 = vadd.f32 0.5, %v659_v45 }
 0x300   :  { %v1910_v52 = vadd.f32 %v662_v41, %v661_v38 }
 0x302   :  { %1449 = vtanh.f32 %v1910_v52 }
 0x30f   :  { %v1450_v49 = vpop.eup %1449 }
 0x310   :  { %v665_v27 = vmul.f32 %v1450_v49, %v660_v47 }
 0x312   :  { %v673_v51 = vrot.slane %v665_v27, %v1726_v30  ;;  %v693_v46 = vpack.c.bf16 %v665_v27, %v665_v27 }
 0x314   :  { %v674_v54 = vcombine.high %v673_v51, %v673_v51  ;;  %v681_v55 = vrot.slane %v673_v51, %v1726_v30  ;;  %727 = vmatmul.mubr.bf16.vlgmr.msra.gmra.mxu0 %v693_v46  ;;  %768 = vmatmul.mubr.bf16.vlgmr.msra.gmra.mxu1 %v693_v46 }
 0x315   :  { %823 = vmatpush1.bf16.msra.mxu0 %v1657_v2  ;;  %864 = vmatpush1.bf16.msra.mxu1 %v1662_v4 }
 0x316   :  { %v688_v62 = vrot.slane %v674_v54, %v1726_v30  ;;  %691 = vst.msk [vmem:[#allocation10 + $0x4] sm:$0x1] %vm146_vm0, %v681_v55  ;;  %824 = vmatprep.subr.bf16.mxu0 %v1665_v5  ;;  %865 = vmatprep.subr.bf16.mxu1 %v1670_v7 }
 0x317   :  { %854 = vmatprep.mubr.bf16.mxu0 %v1614_v0  ;;  %895 = vmatprep.mubr.bf16.mxu1 %v1614_v0 }
 0x318   :  { %692 = vst.msk [vmem:[#allocation10 + $0xc] sm:$0x1] %vm146_vm0, %v688_v62 }
 0x319   :  { %825 = vmatpush1.bf16.msra.mxu0 %v1667_v6  ;;  %866 = vmatpush1.bf16.msra.mxu1 %v1674_v8 }
 0x31a   :  { %826 = vmatprep.subr.bf16.mxu0 %v1677_v9  ;;  %867 = vmatprep.subr.bf16.mxu1 %v1682_v11 }
 0x31d   :  { %827 = vmatpush1.bf16.msra.mxu0 %v1680_v10  ;;  %868 = vmatpush1.bf16.msra.mxu1 %v1688_v13 }
 0x31e   :  { %828 = vmatprep.subr.bf16.mxu0 %v1685_v12  ;;  %869 = vmatprep.subr.bf16.mxu1 %v1691_v14 }
 0x321   :  { %829 = vmatpush1.bf16.msra.mxu0 %v1694_v15  ;;  %870 = vmatpush1.bf16.msra.mxu1 %v1700_v19 }
 0x322   :  { %830 = vmatprep.subr.bf16.mxu0 %v1697_v16  ;;  %871 = vmatprep.subr.bf16.mxu1 %v1703_v20 }
 0x325   :  { %831 = vmatpush1.bf16.msra.mxu0 %v1706_v22  ;;  %872 = vmatpush1.bf16.msra.mxu1 %v1712_v25 }
 0x326   :  { %832 = vmatprep.subr.bf16.mxu0 %v1709_v23  ;;  %873 = vmatprep.subr.bf16.mxu1 %v1715_v26 }
 0x329   :  { %833 = vmatpush1.bf16.msra.mxu0 %v1720_v28  ;;  %874 = vmatpush1.bf16.msra.mxu1 %v1729_v31 }
 0x32a   :  { %834 = vmatprep.subr.bf16.mxu0 %v1723_v29  ;;  %875 = vmatprep.subr.bf16.mxu1 %v1732_v33 }
 0x32d   :  { %835 = vmatpush1.bf16.msra.mxu0 %v1736_v35  ;;  %876 = vmatpush1.bf16.msra.mxu1 %v1743_v39 }
 0x32e   :  { %836 = vmatprep.subr.bf16.mxu0 %v1739_v36  ;;  %877 = vmatprep.subr.bf16.mxu1 %v1746_v40 }
 0x331   :  { %837 = vmatpush1.bf16.msra.mxu0 %v1751_v42  ;;  %878 = vmatpush1.bf16.msra.mxu1 %v1756_v43 }
 0x332   :  { %950 = vmatprep.subr.bf16.mxu0 %v1655_v1  ;;  %991 = vmatprep.subr.bf16.mxu1 %v1660_v3 }
 0x3d4   :  { %v728_v56 = vpop.f32.mrf.mxu0  ;;  %v769_v57 = vpop.f32.mrf.mxu1 }
 0x3d5   :  { %v729_v58 = vadd.f32 %v728_v56, %v1802_v48  ;;  %v770_v37 = vadd.f32 %v769_v57, %v1808_v53 }
 0x3d6   :  { %v730_v59 = vpop.f32.mrf.mxu0  ;;  %v771_v60 = vpop.f32.mrf.mxu1 }
 0x3d7   :  { %v776_v61 = vmul.f32 0.5, %v729_v58  ;;  %v731_v63 = vadd.f32 %v730_v59, %v1805_v50  ;;  %v772_v38 = vadd.f32 %v771_v60, %v1813_v21 }
 0x3d8   :  { %v732_v17 = vpop.f32.mrf.mxu0  ;;  %v773_v18 = vpop.f32.mrf.mxu1 }
 0x3d9   :  { %1451 = vtanh.f32 %v776_v61  ;;  %v780_v24 = vmul.f32 0.5, %v731_v63  ;;  %v785_v41 = vmul.f32 0.5, %v772_v38 }
 0x3da   :  { %v733_v32 = vpop.f32.mrf.mxu0  ;;  %v774_v34 = vpop.f32.mrf.mxu1 }
 0x3db   :  { %1453 = vtanh.f32 %v780_v24 }
 0x3dc   :  { %1455 = vtanh.f32 %v770_v37 }
 0x3dd   :  { %1457 = vtanh.f32 %v785_v41 }
 0x3e6   :  { %v1452_v44 = vpop.eup %1451 }
 0x3e7   :  { %v778_v45 = vmul.f32 0.5, %v1452_v44 }
 0x3e8   :  { %v1454_v47 = vpop.eup %1453 }
 0x3e9   :  { %v779_v49 = vadd.f32 0.5, %v778_v45  ;;  %v782_v27 = vmul.f32 0.5, %v1454_v47  ;;  %v1456_v46 = vpop.eup %1455 }
 0x3ea   :  { %v1458_v56 = vpop.eup %1457 }
 0x3eb   :  { %v783_v51 = vadd.f32 0.5, %v782_v27  ;;  %v790_v55 = vmul.f32 %v1456_v46, %v779_v49  ;;  %v787_v57 = vmul.f32 0.5, %v1458_v56 }
 0x3ed   :  { %v789_v54 = vmul.f32 %v783_v51, %v1910_v52  ;;  %v788_v58 = vadd.f32 0.5, %v787_v57 }
 0x3ef   :  { %v1957_v62 = vadd.f32 %v790_v55, %v789_v54 }
 0x3f1   :  { %1459 = vtanh.f32 %v1957_v62 }
 0x3fe   :  { %v1460_v59 = vpop.eup %1459 }
 0x3ff   :  { %v793_v60 = vmul.f32 %v1460_v59, %v788_v58 }
 0x401   :  { %v801_v61 = vrot.slane %v793_v60, %v1726_v30  ;;  %v821_v63 = vpack.c.bf16 %v793_v60, %v793_v60 }
 0x403   :  { %v802_v17 = vcombine.high %v801_v61, %v801_v61  ;;  %v809_v18 = vrot.slane %v801_v61, %v1726_v30  ;;  %855 = vmatmul.mubr.bf16.vlgmr.msra.gmra.mxu0 %v821_v63  ;;  %896 = vmatmul.mubr.bf16.vlgmr.msra.gmra.mxu1 %v821_v63 }
 0x404   :  { %951 = vmatpush1.bf16.msra.mxu0 %v1657_v2  ;;  %992 = vmatpush1.bf16.msra.mxu1 %v1662_v4 }
 0x405   :  { %v816_v52 = vrot.slane %v802_v17, %v1726_v30  ;;  %819 = vst.msk [vmem:[#allocation10 + $0x3] sm:$0x1] %vm146_vm0, %v809_v18  ;;  %952 = vmatprep.subr.bf16.mxu0 %v1665_v5  ;;  %993 = vmatprep.subr.bf16.mxu1 %v1670_v7 }
 0x406   :  { %982 = vmatprep.mubr.bf16.mxu0 %v1614_v0  ;;  %1023 = vmatprep.mubr.bf16.mxu1 %v1614_v0 }
 0x407   :  { %820 = vst.msk [vmem:[#allocation10 + $0xb] sm:$0x1] %vm146_vm0, %v816_v52 }
 0x408   :  { %953 = vmatpush1.bf16.msra.mxu0 %v1667_v6  ;;  %994 = vmatpush1.bf16.msra.mxu1 %v1674_v8 }
 0x409   :  { %954 = vmatprep.subr.bf16.mxu0 %v1677_v9  ;;  %995 = vmatprep.subr.bf16.mxu1 %v1682_v11 }
 0x40c   :  { %955 = vmatpush1.bf16.msra.mxu0 %v1680_v10  ;;  %996 = vmatpush1.bf16.msra.mxu1 %v1688_v13 }
 0x40d   :  { %956 = vmatprep.subr.bf16.mxu0 %v1685_v12  ;;  %997 = vmatprep.subr.bf16.mxu1 %v1691_v14 }
 0x410   :  { %957 = vmatpush1.bf16.msra.mxu0 %v1694_v15  ;;  %998 = vmatpush1.bf16.msra.mxu1 %v1700_v19 }
 0x411   :  { %958 = vmatprep.subr.bf16.mxu0 %v1697_v16  ;;  %999 = vmatprep.subr.bf16.mxu1 %v1703_v20 }
 0x414   :  { %959 = vmatpush1.bf16.msra.mxu0 %v1706_v22  ;;  %1000 = vmatpush1.bf16.msra.mxu1 %v1712_v25 }
 0x415   :  { %960 = vmatprep.subr.bf16.mxu0 %v1709_v23  ;;  %1001 = vmatprep.subr.bf16.mxu1 %v1715_v26 }
 0x418   :  { %961 = vmatpush1.bf16.msra.mxu0 %v1720_v28  ;;  %1002 = vmatpush1.bf16.msra.mxu1 %v1729_v31 }
 0x419   :  { %962 = vmatprep.subr.bf16.mxu0 %v1723_v29  ;;  %1003 = vmatprep.subr.bf16.mxu1 %v1732_v33 }
 0x41c   :  { %963 = vmatpush1.bf16.msra.mxu0 %v1736_v35  ;;  %1004 = vmatpush1.bf16.msra.mxu1 %v1743_v39 }
 0x41d   :  { %964 = vmatprep.subr.bf16.mxu0 %v1739_v36  ;;  %1005 = vmatprep.subr.bf16.mxu1 %v1746_v40 }
 0x420   :  { %965 = vmatpush1.bf16.msra.mxu0 %v1751_v42  ;;  %1006 = vmatpush1.bf16.msra.mxu1 %v1756_v43 }
 0x421   :  { %1078 = vmatprep.subr.bf16.mxu0 %v1655_v1  ;;  %1119 = vmatprep.subr.bf16.mxu1 %v1660_v3 }
 0x4c3   :  { %v856_v24 = vpop.f32.mrf.mxu0  ;;  %v897_v32 = vpop.f32.mrf.mxu1 }
 0x4c4   :  { %v857_v34 = vadd.f32 %v856_v24, %v1802_v48  ;;  %v898_v46 = vadd.f32 %v897_v32, %v1808_v53 }
 0x4c5   :  { %v858_v37 = vpop.f32.mrf.mxu0  ;;  %v899_v38 = vpop.f32.mrf.mxu1 }
 0x4c6   :  { %v904_v41 = vmul.f32 0.5, %v857_v34  ;;  %v859_v44 = vadd.f32 %v858_v37, %v1805_v50  ;;  %v900_v1 = vadd.f32 %v899_v38, %v1813_v21 }
 0x4c7   :  { %v860_v45 = vpop.f32.mrf.mxu0  ;;  %v901_v47 = vpop.f32.mrf.mxu1 }
 0x4c8   :  { %1461 = vtanh.f32 %v904_v41  ;;  %v908_v49 = vmul.f32 0.5, %v859_v44  ;;  %v913_v3 = vmul.f32 0.5, %v900_v1  ;;  %v1493_v1 = vld [vmem:[#allocation9 + $0xe0] ss:$16 sps:$4 sm:$0xff]  }
 0x4c9   :  { %v861_v27 = vpop.f32.mrf.mxu0  ;;  %v902_v51 = vpop.f32.mrf.mxu1 }
 0x4ca   :  { %1463 = vtanh.f32 %v908_v49 }
 0x4cb   :  { %1465 = vtanh.f32 %v898_v46 }
 0x4cc   :  { %1467 = vtanh.f32 %v913_v3  ;;  %v1494_v3 = vld [vmem:[#allocation9 + $0xe8] ss:$16 sps:$4 sm:$0xff]  }
 0x4d5   :  { %v1462_v54 = vpop.eup %1461 }
 0x4d6   :  { %v906_v55 = vmul.f32 0.5, %v1462_v54 }
 0x4d7   :  { %v1464_v56 = vpop.eup %1463 }
 0x4d8   :  { %v907_v57 = vadd.f32 0.5, %v906_v55  ;;  %v910_v58 = vmul.f32 0.5, %v1464_v56  ;;  %v1466_v60 = vpop.eup %1465  ;;  %v1495_v55 = vld [vmem:[#allocation9 + $0xc4] ss:$16 sps:$4 sm:$0xff]   ;;  %v1496_v56 = vld [vmem:[#allocation9 + $0xcc] ss:$16 sps:$4 sm:$0xff]  }
 0x4d9   :  { %v1468_v18 = vpop.eup %1467 }
 0x4da   :  { %v911_v59 = vadd.f32 0.5, %v910_v58  ;;  %v918_v63 = vmul.f32 %v1466_v60, %v907_v57  ;;  %v915_v52 = vmul.f32 0.5, %v1468_v18  ;;  %v1497_v57 = vld [vmem:[#allocation9 + $0xc0] ss:$16 sps:$4 sm:$0xff]   ;;  %v1498_v58 = vld [vmem:[#allocation9 + $0xc8] ss:$16 sps:$4 sm:$0xff]  }
 0x4db   :  { %v1500_v60 = vld [vmem:[#allocation9 + $0xac] ss:$16 sps:$4 sm:$0xff]  }
 0x4dc   :  { %v917_v61 = vmul.f32 %v911_v59, %v1957_v62  ;;  %v916_v24 = vadd.f32 0.5, %v915_v52  ;;  %v1499_v59 = vld [vmem:[#allocation9 + $0xa4] ss:$16 sps:$4 sm:$0xff]   ;;  %v1504_v18 = vld [vmem:[#allocation9 + $0x8c] ss:$16 sps:$4 sm:$0xff]  }
 0x4dd   :  { %v1505_v52 = vld [vmem:[#allocation9 + $0x80] ss:$16 sps:$4 sm:$0xff]  }
 0x4de   :  { %v2004_v17 = vadd.f32 %v918_v63, %v917_v61  ;;  %v1501_v61 = vld [vmem:[#allocation9 + $0xa0] ss:$16 sps:$4 sm:$0xff]   ;;  %v1502_v63 = vld [vmem:[#allocation9 + $0xa8] ss:$16 sps:$4 sm:$0xff]  }
 0x4e0   :  { %1469 = vtanh.f32 %v2004_v17 }
 0x4ed   :  { %v1470_v32 = vpop.eup %1469 }
 0x4ee   :  { %v921_v34 = vmul.f32 %v1470_v32, %v916_v24  ;;  %v1507_v24 = vld [vmem:[#allocation9 + $0x64] ss:$16 sps:$4 sm:$0xff]   ;;  %v1508_v32 = vld [vmem:[#allocation9 + $0x6c] ss:$16 sps:$4 sm:$0xff]  }
 0x4f0   :  { %v929_v37 = vrot.slane %v921_v34, %v1726_v30  ;;  %v949_v38 = vpack.c.bf16 %v921_v34, %v921_v34  ;;  %v1509_v34 = vld [vmem:[#allocation9 + $0x60] ss:$16 sps:$4 sm:$0xff]  }
 0x4f2   :  { %v930_v41 = vcombine.high %v929_v37, %v929_v37  ;;  %v937_v44 = vrot.slane %v929_v37, %v1726_v30  ;;  %983 = vmatmul.mubr.bf16.vlgmr.msra.gmra.mxu0 %v949_v38  ;;  %1024 = vmatmul.mubr.bf16.vlgmr.msra.gmra.mxu1 %v949_v38  ;;  %v1510_v37 = vld [vmem:[#allocation9 + $0x68] ss:$16 sps:$4 sm:$0xff]   ;;  %v1511_v38 = vld [vmem:[#allocation9 + $0x44] ss:$16 sps:$4 sm:$0xff]  }
 0x4f3   :  { %1079 = vmatpush1.bf16.msra.mxu0 %v1657_v2  ;;  %1120 = vmatpush1.bf16.msra.mxu1 %v1662_v4  ;;  %v1491_v2 = vld [vmem:[#allocation9 + $0xe4] ss:$16 sps:$4 sm:$0xff]   ;;  %v1492_v4 = vld [vmem:[#allocation9 + $0xec] ss:$16 sps:$4 sm:$0xff]  }
 0x4f4   :  { %v944_v62 = vrot.slane %v930_v41, %v1726_v30  ;;  %947 = vst.msk [vmem:[#allocation10 + $0x2] sm:$0x1] %vm146_vm0, %v937_v44  ;;  %1080 = vmatprep.subr.bf16.mxu0 %v1665_v5  ;;  %1121 = vmatprep.subr.bf16.mxu1 %v1670_v7  ;;  %v1512_v41 = vld [vmem:[#allocation9 + $0x4c] ss:$16 sps:$4 sm:$0xff]   ;;  %v1513_v44 = vld [vmem:[#allocation9 + $0x40] ss:$16 sps:$4 sm:$0xff]  }
 0x4f5   :  { %1110 = vmatprep.mubr.bf16.mxu0 %v1614_v0  ;;  %1151 = vmatprep.mubr.bf16.mxu1 %v1614_v0 }
 0x4f6   :  { %948 = vst.msk [vmem:[#allocation10 + $0xa] sm:$0x1] %vm146_vm0, %v944_v62  ;;  %v1514_v62 = vld [vmem:[#allocation9 + $0x48] ss:$16 sps:$4 sm:$0xff]  }
 0x4f7   :  { %1081 = vmatpush1.bf16.msra.mxu0 %v1667_v6  ;;  %1122 = vmatpush1.bf16.msra.mxu1 %v1674_v8 }
 0x4f8   :  { %1082 = vmatprep.subr.bf16.mxu0 %v1677_v9  ;;  %1123 = vmatprep.subr.bf16.mxu1 %v1682_v11 }
 0x4fb   :  { %1083 = vmatpush1.bf16.msra.mxu0 %v1680_v10  ;;  %1124 = vmatpush1.bf16.msra.mxu1 %v1688_v13 }
 0x4fc   :  { %1084 = vmatprep.subr.bf16.mxu0 %v1685_v12  ;;  %1125 = vmatprep.subr.bf16.mxu1 %v1691_v14 }
 0x4ff   :  { %1085 = vmatpush1.bf16.msra.mxu0 %v1694_v15  ;;  %1126 = vmatpush1.bf16.msra.mxu1 %v1700_v19 }
 0x500   :  { %1086 = vmatprep.subr.bf16.mxu0 %v1697_v16  ;;  %1127 = vmatprep.subr.bf16.mxu1 %v1703_v20 }
 0x503   :  { %1087 = vmatpush1.bf16.msra.mxu0 %v1706_v22  ;;  %1128 = vmatpush1.bf16.msra.mxu1 %v1712_v25 }
 0x504   :  { %1088 = vmatprep.subr.bf16.mxu0 %v1709_v23  ;;  %1129 = vmatprep.subr.bf16.mxu1 %v1715_v26 }
 0x507   :  { %1089 = vmatpush1.bf16.msra.mxu0 %v1720_v28  ;;  %1130 = vmatpush1.bf16.msra.mxu1 %v1729_v31 }
 0x508   :  { %1090 = vmatprep.subr.bf16.mxu0 %v1723_v29  ;;  %1131 = vmatprep.subr.bf16.mxu1 %v1732_v33 }
 0x50b   :  { %1091 = vmatpush1.bf16.msra.mxu0 %v1736_v35  ;;  %1132 = vmatpush1.bf16.msra.mxu1 %v1743_v39 }
 0x50c   :  { %1092 = vmatprep.subr.bf16.mxu0 %v1739_v36  ;;  %1133 = vmatprep.subr.bf16.mxu1 %v1746_v40 }
 0x50f   :  { %1093 = vmatpush1.bf16.msra.mxu0 %v1751_v42  ;;  %1134 = vmatpush1.bf16.msra.mxu1 %v1756_v43 }
 0x510   :  { %1206 = vmatprep.subr.bf16.mxu0 %v1491_v2  ;;  %1247 = vmatprep.subr.bf16.mxu1 %v1492_v4  ;;  %v1515_v2 = vld [vmem:[#allocation9 + $0x24] ss:$16 sps:$4 sm:$0xff]   ;;  %v1516_v4 = vld [vmem:[#allocation9 + $0x2c] ss:$16 sps:$4 sm:$0xff]  }
 0x5b2   :  { %v984_v5 = vpop.f32.mrf.mxu0  ;;  %v1025_v6 = vpop.f32.mrf.mxu1 }
 0x5b3   :  { %v985_v7 = vadd.f32 %v984_v5, %v1802_v48  ;;  %v1026_v19 = vadd.f32 %v1025_v6, %v1808_v53  ;;  %v1517_v5 = vld [vmem:[#allocation9 + $0x20] ss:$16 sps:$4 sm:$0xff]   ;;  %v1518_v6 = vld [vmem:[#allocation9 + $0x28] ss:$16 sps:$4 sm:$0xff]  }
 0x5b4   :  { %v986_v8 = vpop.f32.mrf.mxu0  ;;  %v1027_v9 = vpop.f32.mrf.mxu1 }
 0x5b5   :  { %v1032_v10 = vmul.f32 0.5, %v985_v7  ;;  %v987_v11 = vadd.f32 %v986_v8, %v1805_v50  ;;  %v1028_v20 = vadd.f32 %v1027_v9, %v1813_v21  ;;  %v1519_v7 = vld [vmem:[#allocation9 + $0x4] ss:$16 sps:$4 sm:$0xff]   ;;  %v1520_v8 = vld [vmem:[#allocation9 + $0xc] ss:$16 sps:$4 sm:$0xff]  }
 0x5b6   :  { %v988_v12 = vpop.f32.mrf.mxu0  ;;  %v1029_v13 = vpop.f32.mrf.mxu1  ;;  %v1521_v9 = vld [vmem:[#allocation9] ss:$16 sps:$4 sm:$0xff]  }
 0x5b7   :  { %1471 = vtanh.f32 %v1032_v10  ;;  %v1036_v14 = vmul.f32 0.5, %v987_v11  ;;  %v1041_v22 = vmul.f32 0.5, %v1028_v20  ;;  %v1522_v10 = vld [vmem:[#allocation9 + $0x8] ss:$16 sps:$4 sm:$0xff]  }
 0x5b8   :  { %v989_v15 = vpop.f32.mrf.mxu0  ;;  %v1030_v16 = vpop.f32.mrf.mxu1 }
 0x5b9   :  { %1473 = vtanh.f32 %v1036_v14 }
 0x5ba   :  { %1475 = vtanh.f32 %v1026_v19 }
 0x5bb   :  { %1477 = vtanh.f32 %v1041_v22 }
 0x5c4   :  { %v1472_v23 = vpop.eup %1471 }
 0x5c5   :  { %v1034_v25 = vmul.f32 0.5, %v1472_v23 }
 0x5c6   :  { %v1474_v26 = vpop.eup %1473 }
 0x5c7   :  { %v1035_v28 = vadd.f32 0.5, %v1034_v25  ;;  %v1038_v29 = vmul.f32 0.5, %v1474_v26  ;;  %v1476_v33 = vpop.eup %1475 }
 0x5c8   :  { %v1478_v40 = vpop.eup %1477 }
 0x5c9   :  { %v1039_v31 = vadd.f32 0.5, %v1038_v29  ;;  %v1046_v36 = vmul.f32 %v1476_v33, %v1035_v28  ;;  %v1043_v42 = vmul.f32 0.5, %v1478_v40 }
 0x5cb   :  { %v1045_v35 = vmul.f32 %v1039_v31, %v2004_v17  ;;  %v1044_v43 = vadd.f32 0.5, %v1043_v42  ;;  %v1503_v17 = vld [vmem:[#allocation9 + $0x84] ss:$16 sps:$4 sm:$0xff]  }
 0x5cd   :  { %v2049_v39 = vadd.f32 %v1046_v36, %v1045_v35 }
 0x5cf   :  { %1479 = vtanh.f32 %v2049_v39 }
 0x5dc   :  { %v1480_v45 = vpop.eup %1479 }
 0x5dd   :  { %v1049_v47 = vmul.f32 %v1480_v45, %v1044_v43 }
 0x5df   :  { %v1057_v49 = vrot.slane %v1049_v47, %v1726_v30  ;;  %v1077_v27 = vpack.c.bf16 %v1049_v47, %v1049_v47 }
 0x5e1   :  { %v1058_v51 = vcombine.high %v1057_v49, %v1057_v49  ;;  %v1065_v46 = vrot.slane %v1057_v49, %v1726_v30  ;;  %1111 = vmatmul.mubr.bf16.vlgmr.msra.gmra.mxu0 %v1077_v27  ;;  %1152 = vmatmul.mubr.bf16.vlgmr.msra.gmra.mxu1 %v1077_v27 }
 0x5e2   :  { %1207 = vmatpush1.bf16.msra.mxu0 %v1493_v1  ;;  %1248 = vmatpush1.bf16.msra.mxu1 %v1494_v3 }
 0x5e3   :  { %v1072_v54 = vrot.slane %v1058_v51, %v1726_v30  ;;  %1075 = vst.msk [vmem:[#allocation10 + $0x1] sm:$0x1] %vm146_vm0, %v1065_v46  ;;  %1208 = vmatprep.subr.bf16.mxu0 %v1495_v55  ;;  %1249 = vmatprep.subr.bf16.mxu1 %v1496_v56 }
 0x5e4   :  { %1238 = vmatprep.mubr.bf16.mxu0 %v1614_v0  ;;  %1279 = vmatprep.mubr.bf16.mxu1 %v1614_v0  ;;  %v1506_v0 = vld [vmem:[#allocation9 + $0x88] ss:$16 sps:$4 sm:$0xff]  }
 0x5e5   :  { %1076 = vst.msk [vmem:[#allocation10 + $0x9] sm:$0x1] %vm146_vm0, %v1072_v54 }
 0x5e6   :  { %1209 = vmatpush1.bf16.msra.mxu0 %v1497_v57  ;;  %1250 = vmatpush1.bf16.msra.mxu1 %v1498_v58 }
 0x5e7   :  { %1210 = vmatprep.subr.bf16.mxu0 %v1499_v59  ;;  %1251 = vmatprep.subr.bf16.mxu1 %v1500_v60 }
 0x5ea   :  { %1211 = vmatpush1.bf16.msra.mxu0 %v1501_v61  ;;  %1252 = vmatpush1.bf16.msra.mxu1 %v1502_v63 }
 0x5eb   :  { %1212 = vmatprep.subr.bf16.mxu0 %v1503_v17  ;;  %1253 = vmatprep.subr.bf16.mxu1 %v1504_v18 }
 0x5ee   :  { %1213 = vmatpush1.bf16.msra.mxu0 %v1505_v52  ;;  %1254 = vmatpush1.bf16.msra.mxu1 %v1506_v0 }
 0x5ef   :  { %1214 = vmatprep.subr.bf16.mxu0 %v1507_v24  ;;  %1255 = vmatprep.subr.bf16.mxu1 %v1508_v32 }
 0x5f2   :  { %1215 = vmatpush1.bf16.msra.mxu0 %v1509_v34  ;;  %1256 = vmatpush1.bf16.msra.mxu1 %v1510_v37 }
 0x5f3   :  { %1216 = vmatprep.subr.bf16.mxu0 %v1511_v38  ;;  %1257 = vmatprep.subr.bf16.mxu1 %v1512_v41 }
 0x5f6   :  { %1217 = vmatpush1.bf16.msra.mxu0 %v1513_v44  ;;  %1258 = vmatpush1.bf16.msra.mxu1 %v1514_v62 }
 0x5f7   :  { %1218 = vmatprep.subr.bf16.mxu0 %v1515_v2  ;;  %1259 = vmatprep.subr.bf16.mxu1 %v1516_v4 }
 0x5fa   :  { %1219 = vmatpush1.bf16.msra.mxu0 %v1517_v5  ;;  %1260 = vmatpush1.bf16.msra.mxu1 %v1518_v6 }
 0x5fb   :  { %1220 = vmatprep.subr.bf16.mxu0 %v1519_v7  ;;  %1261 = vmatprep.subr.bf16.mxu1 %v1520_v8 }
 0x5fe   :  { %1221 = vmatpush1.bf16.msra.mxu0 %v1521_v9  ;;  %1262 = vmatpush1.bf16.msra.mxu1 %v1522_v10 }
 0x6a1   :  { %v1112_v11 = vpop.f32.mrf.mxu0  ;;  %v1153_v12 = vpop.f32.mrf.mxu1 }
 0x6a2   :  { %v1113_v13 = vadd.f32 %v1112_v11, %v1802_v48  ;;  %v1154_v28 = vadd.f32 %v1153_v12, %v1808_v53 }
 0x6a3   :  { %v1114_v14 = vpop.f32.mrf.mxu0  ;;  %v1155_v15 = vpop.f32.mrf.mxu1 }
 0x6a4   :  { %v1160_v16 = vmul.f32 0.5, %v1113_v13  ;;  %v1115_v19 = vadd.f32 %v1114_v14, %v1805_v50  ;;  %v1156_v29 = vadd.f32 %v1155_v15, %v1813_v21 }
 0x6a5   :  { %v1116_v20 = vpop.f32.mrf.mxu0  ;;  %v1157_v22 = vpop.f32.mrf.mxu1 }
 0x6a6   :  { %1481 = vtanh.f32 %v1160_v16  ;;  %v1164_v23 = vmul.f32 0.5, %v1115_v19  ;;  %v1169_v31 = vmul.f32 0.5, %v1156_v29 }
 0x6a7   :  { %v1117_v25 = vpop.f32.mrf.mxu0  ;;  %v1158_v26 = vpop.f32.mrf.mxu1 }
 0x6a8   :  { %1483 = vtanh.f32 %v1164_v23 }
 0x6a9   :  { %1485 = vtanh.f32 %v1154_v28 }
 0x6aa   :  { %1487 = vtanh.f32 %v1169_v31 }
 0x6b3   :  { %v1482_v33 = vpop.eup %1481 }
 0x6b4   :  { %v1162_v48 = vmul.f32 0.5, %v1482_v33 }
 0x6b5   :  { %v1484_v35 = vpop.eup %1483 }
 0x6b6   :  { %v1163_v36 = vadd.f32 0.5, %v1162_v48  ;;  %v1166_v40 = vmul.f32 0.5, %v1484_v35  ;;  %v1486_v42 = vpop.eup %1485 }
 0x6b7   :  { %v1488_v49 = vpop.eup %1487 }
 0x6b8   :  { %v1167_v50 = vadd.f32 0.5, %v1166_v40  ;;  %v1174_v45 = vmul.f32 %v1486_v42, %v1163_v36  ;;  %v1171_v53 = vmul.f32 0.5, %v1488_v49 }
 0x6ba   :  { %v1173_v43 = vmul.f32 %v1167_v50, %v2049_v39  ;;  %v1172_v27 = vadd.f32 0.5, %v1171_v53 }
 0x6bc   :  { %v1175_v47 = vadd.f32 %v1174_v45, %v1173_v43 }
 0x6be   :  { %1489 = vtanh.f32 %v1175_v47 }
 0x6cb   :  { %v1490_v51 = vpop.eup %1489 }
 0x6cc   :  { %v1177_v46 = vmul.f32 %v1490_v51, %v1172_v27 }
 0x6ce   :  { %v1185_v21 = vrot.slane %v1177_v46, %v1726_v30  ;;  %v1205_v1 = vpack.c.bf16 %v1177_v46, %v1177_v46 }
 0x6d0   :  { %v1186_v3 = vcombine.high %v1185_v21, %v1185_v21  ;;  %v1193_v54 = vrot.slane %v1185_v21, %v1726_v30  ;;  %1239 = vmatmul.mubr.bf16.vlgmr.msra.gmra.mxu0 %v1205_v1  ;;  %1280 = vmatmul.mubr.bf16.vlgmr.msra.gmra.mxu1 %v1205_v1 }
 0x6d2   :  { %v1200_v55 = vrot.slane %v1186_v3, %v1726_v30  ;;  %1203 = vst.msk [vmem:[#allocation10] sm:$0x1] %vm146_vm0, %v1193_v54 }
 0x6d4   :  { %1204 = vst.msk [vmem:[#allocation10 + $0x8] sm:$0x1] %vm146_vm0, %v1200_v55 }
 0x6d5   :  { %1594 = shalt.err (!%p1591_p5)
}
 0x6d6   :  { %s1617_s7 = smov 128   ;;  %s1618_s8 = smov 8  }
 0x6d7   :  { %1322 = dma.vmem_to_hbm [thread:$0]  %s1317_s5, 256, %s2076_s4, [#allocation6], %s1617_s7, %s1617_s7, %s1618_s8  }
 0x790   :  { %v1240_v30 = vpop.f32.mrf.mxu0  ;;  %v1281_v39 = vpop.f32.mrf.mxu1 }
 0x792   :  { %v1242_v56 = vpop.f32.mrf.mxu0  ;;  %v1283_v57 = vpop.f32.mrf.mxu1 }
 0x794   :  { %v1244_v58 = vpop.f32.mrf.mxu0  ;;  %v1285_v59 = vpop.f32.mrf.mxu1 }
 0x796   :  { %v1245_v60 = vpop.f32.mrf.mxu0  ;;  %v1286_v61 = vpop.f32.mrf.mxu1 }
 0x797   :  { %1607 = dma.done.wait [#allocation6], 256  }
 0x798   :  { %1608 = vsyncadd [#allocation6], 4294967040 }
 0x799   :  { %1326 = vsyncpa [#allocation5], 1 }
 0x79a   :  { %1327 = vsyncpa [#allocation8], 1 }
 0x79b   :  { %1328 = vsyncpa [#allocation6], 1 }

</bundles_post_ra>
